<compile_context>
chip_gen: v7x
topology: tpu7x:2x2x1
jax: 0.10.0
libtpu: 0.0.40
codegen_flags: <defaults>
</compile_context>

<pallas_src>
import jax
import jax.numpy as jnp
import numpy as np
from jax.experimental import pallas as pl
from jax.experimental.pallas import tpu as pltpu

_MiB = 1024 * 1024


def _round_up(x, m):
    return ((x + m - 1) // m) * m


def _discriminator_kernel(x_ref, w1_ref, b1_ref, w2_ref, b2_ref, w3_ref, b3_ref, out_ref):
    # x tile arrives in its source dtype (f32 or bf16); feed the MXU in bf16,
    # accumulate in f32. (astype is a no-op if the caller already passes bf16.)
    x = x_ref[...].astype(jnp.bfloat16)                                    # (TB, D)

    # Linear 1 + LeakyReLU(0.2): maximum(h, 0.2h) == where(h>0, h, 0.2h) for
    # slope < 1 and lowers to a single vmax instead of compare+select.
    h1 = jnp.dot(x, w1_ref[...], preferred_element_type=jnp.float32) + b1_ref[...]
    h1 = jnp.maximum(h1, 0.2 * h1)                                         # (TB, 512) f32

    # Linear 2 + LeakyReLU(0.2)
    h2 = jnp.dot(h1.astype(jnp.bfloat16), w2_ref[...],
                 preferred_element_type=jnp.float32) + b2_ref[...]
    h2 = jnp.maximum(h2, 0.2 * h2)                                         # (TB, 256) f32

    # Linear 3 (out dim = 1), computed transposed: (1,256) . (TB,256)^T -> (1, TB).
    # K=256, M=1 so the MXU time is negligible, and the result lands lane-dense,
    # so the store below is a full-lane vst instead of masked (TB, 1) column stores.
    w3 = w3_ref[...].astype(jnp.float32)                                   # (1, 256)
    logit = jnp.einsum("ok,bk->ob", w3, h2,
                       preferred_element_type=jnp.float32) + b3_ref[0, 0]  # (1, TB)

    # Sigmoid on the EUP: exp + approximate reciprocal (~1e-3 rel err; fine for
    # a forward pass / thresholding).
    out_ref[...] = pl.reciprocal(1.0 + jnp.exp(-logit), approx=True)


def discriminator_forward(img, params, *, block_b=512):
    """Forward pass of the GAN discriminator.

    img:    (B, C, H, W) float32 or bfloat16 (NCHW, PyTorch convention). Passing
            bf16 halves the dominant HBM traffic (the x stream); no standalone
            pre-kernel cast is inserted here since that would cost its own HBM pass.
    params: (w1 (D,512) bf16, b1 (1,512) f32,
             w2 (512,256) bf16, b2 (1,256) f32,
             w3 row (1,256) bf16, b3 (1,1) f32)
    returns (B, 1) float32 probabilities.
    """
    assert block_b % 128 == 0, "block_b must be a multiple of 128 (lane width)"
    w1, b1, w2, b2, w3t, b3 = params
    B = img.shape[0]
    D = int(np.prod(img.shape[1:]))
    x = img.reshape(B, D)                               # row-major flatten == torch .view

    # --- hardware query: per-generation VMEM cap, 2-TensorCore (v7x) detection ---
    vmem_cap = None
    try:
        vmem_cap = int(pltpu.get_tpu_info().vmem_capacity_bytes)
    except Exception:
        pass
    # v7x exposes 64 MiB per TensorCore (and has 2 TCs); v5e/v6e expose 128 MiB.
    two_core = vmem_cap is not None and vmem_cap <= 64 * _MiB
    if vmem_cap is None:
        vmem_cap = 64 * _MiB                            # conservative fallback

    # --- batch tile: large tiles amortize per-step overhead and fill the 256-wide
    #     MXU M dim on v6e/v7x; multiple of 128 keeps the x block and the
    #     lane-dense output block layout-legal when the grid has >1 step.
    if B <= block_b:
        TB = _round_up(B, 8)                            # single tile: block == full dims
        if two_core and TB >= 256:
            TB = _round_up((B + 1) // 2, 128)           # split so both v7x TCs get work
    else:
        TB = block_b
    Bp = _round_up(B, TB)
    if Bp != B:
        x = jnp.pad(x, ((0, Bp - B), (0, 0)))
    grid_len = Bp // TB

    # --- VMEM budget: single-buffered weights + double-buffered x/out tiles +
    #     activations, with margin; capped at physical VMEM minus 16 MiB headroom.
    bytes_w = (D * 512 + 512 * 256 + 256) * 2           # bf16 weights, 1 buffer each
    bytes_b = (512 + 256) * 4                           # f32 biases in VMEM
    bytes_x = 2 * TB * D * x.dtype.itemsize             # double-buffered input tile
    bytes_o = 2 * TB * 4                                # double-buffered output row
    bytes_act = TB * (512 + 256) * 6                    # f32 h1/h2 + bf16 copies
    budget = int(1.5 * (bytes_w + bytes_b + bytes_x + bytes_o + bytes_act)) + 4 * _MiB
    vmem_limit = int(min(max(budget, 16 * _MiB), vmem_cap - 16 * _MiB))

    # --- advisory cost estimate for the XLA scheduler ---
    flops = 2 * Bp * (D * 512 + 512 * 256 + 256)
    bytes_accessed = (x.size * x.dtype.itemsize
                      + (w1.size + w2.size + w3t.size) * 2
                      + (b1.size + b2.size + b3.size) * 4
                      + Bp * 4)
    cost = pl.CostEstimate(flops=flops, transcendentals=Bp, bytes_accessed=bytes_accessed)

    # v7x: explicitly split the batch-tile axis across both TensorCores (plain
    # "parallel" does not change codegen; only core_parallel does). Require an even
    # number of grid steps so the split is balanced / divisible.
    if two_core and grid_len >= 2 and grid_len % 2 == 0:
        batch_sem = pltpu.CORE_PARALLEL
    else:
        batch_sem = pltpu.PARALLEL

    # Constant-index weight/bias blocks: single-buffer them instead of the default
    # double buffer (halves resident-weight VMEM; matters for large D on v7x).
    resident = pl.Buffered(1)

    out = pl.pallas_call(
        _discriminator_kernel,
        out_shape=jax.ShapeDtypeStruct((1, Bp), jnp.float32),      # lane-dense row
        grid_spec=pltpu.PrefetchScalarGridSpec(
            num_scalar_prefetch=0,
            grid=(grid_len,),
            in_specs=[
                pl.BlockSpec((TB, D), lambda i: (i, 0)),           # x: streamed per tile
                pl.BlockSpec((D, 512), lambda i: (0, 0), pipeline_mode=resident),   # w1
                pl.BlockSpec((1, 512), lambda i: (0, 0), pipeline_mode=resident),   # b1
                pl.BlockSpec((512, 256), lambda i: (0, 0), pipeline_mode=resident),  # w2
                pl.BlockSpec((1, 256), lambda i: (0, 0), pipeline_mode=resident),   # b2
                pl.BlockSpec((1, 256), lambda i: (0, 0), pipeline_mode=resident),   # w3 row
                pl.BlockSpec(memory_space=pltpu.MemorySpace.SMEM),                  # b3 scalar
            ],
            out_specs=pl.BlockSpec((1, TB), lambda i: (0, i)),
        ),
        compiler_params=pltpu.CompilerParams(
            dimension_semantics=(batch_sem,),
            vmem_limit_bytes=vmem_limit,
        ),
        cost_estimate=cost,
    )(x, w1, b1, w2, b2, w3t, b3)

    return out[0, :B].reshape(B, 1)


def init_params(in_dim, key):
    """PyTorch-default-like Linear init (uniform +-1/sqrt(fan_in)).

    Weights are stored (in, out) and shipped bf16; the last layer's weight is stored
    transposed as a (1, 256) row for the in-kernel transposed matmul. Biases stay f32.
    """
    dims = [(in_dim, 512), (512, 256), (256, 1)]
    params = []
    for i, (fin, fout) in enumerate(dims):
        kw, kb = jax.random.split(jax.random.fold_in(key, i))
        bound = 1.0 / np.sqrt(fin)
        w = jax.random.uniform(kw, (fin, fout), jnp.float32, -bound, bound)
        b = jax.random.uniform(kb, (1, fout), jnp.float32, -bound, bound)
        if fout == 1:
            w = w.T                                              # (1, 256) row for layer 3
        params += [w.astype(jnp.bfloat16), b]
    return tuple(params)


def _reference_forward(img, params):
    """Plain-JAX reference matching the kernel numerics (bf16 weights, f32 accumulation)."""
    w1, b1, w2, b2, w3t, b3 = params
    x = img.reshape(img.shape[0], -1).astype(jnp.bfloat16).astype(jnp.float32)
    h = x @ w1.astype(jnp.float32) + b1
    h = jnp.maximum(h, 0.2 * h)
    h = h.astype(jnp.bfloat16).astype(jnp.float32) @ w2.astype(jnp.float32) + b2
    h = jnp.maximum(h, 0.2 * h)
    h = h @ w3t.astype(jnp.float32).T + b3
    return jax.nn.sigmoid(h)


if __name__ == "__main__":
    # Small shapes consistent with the module: batch=2, channels=4, img_size=16.
    B, C, H, W = 2, 4, 16, 16
    key = jax.random.PRNGKey(0)
    k_img, k_par = jax.random.split(key)

    img = jax.random.normal(k_img, (B, C, H, W), jnp.float32)
    params = init_params(C * H * W, k_par)

    fwd = jax.jit(discriminator_forward)
    out = jax.block_until_ready(fwd(img, params))
    ref = _reference_forward(img, params)

    assert out.shape == (B, 1), out.shape
    # bf16 weights + approx reciprocal in the sigmoid -> relaxed (but tight) tolerance.
    np.testing.assert_allclose(np.asarray(out), np.asarray(ref), rtol=2e-3, atol=2e-3)
    print("KERNEL_OK")
</pallas_src>

<mosaic_0001>
module attributes {stable_mosaic.version = 11 : i64} {
  func.func @_discriminator_kernel(%arg0: i32, %arg1: memref<8x1024xf32, #tpu.memory_space<vmem>>, %arg2: memref<1024x512xbf16, #tpu.memory_space<vmem>>, %arg3: memref<1x512xf32, #tpu.memory_space<vmem>>, %arg4: memref<512x256xbf16, #tpu.memory_space<vmem>>, %arg5: memref<1x256xf32, #tpu.memory_space<vmem>>, %arg6: memref<1x256xbf16, #tpu.memory_space<vmem>>, %arg7: memref<1x1xf32, #tpu.memory_space<smem>>, %arg8: memref<1x8xf32, #tpu.memory_space<vmem>>) attributes {dimension_semantics = [#tpu.dimension_semantics<parallel>], iteration_bounds = array<i64: 1>, scalar_prefetch = 0 : i64, scratch_operands = 0 : i64, tpu.core_type = #tpu.core_type<tc>, window_params = [{transform_indices = @transform_0, window_bounds = array<i64: 8, 1024>}, {pipeline_mode = #tpu.pipeline_mode<synchronous>, transform_indices = @transform_1, window_bounds = array<i64: 1024, 512>}, {pipeline_mode = #tpu.pipeline_mode<synchronous>, transform_indices = @transform_2, window_bounds = array<i64: 1, 512>}, {pipeline_mode = #tpu.pipeline_mode<synchronous>, transform_indices = @transform_3, window_bounds = array<i64: 512, 256>}, {pipeline_mode = #tpu.pipeline_mode<synchronous>, transform_indices = @transform_4, window_bounds = array<i64: 1, 256>}, {pipeline_mode = #tpu.pipeline_mode<synchronous>, transform_indices = @transform_5, window_bounds = array<i64: 1, 256>}, {transform_indices = @transform_6, window_bounds = array<i64: 1, 1>}, {transform_indices = @transform_7, window_bounds = array<i64: 1, 8>}]} {
    %c0 = arith.constant 0 : index
    %c0_0 = arith.constant 0 : index
    %0 = vector.load %arg1[%c0, %c0_0] : memref<8x1024xf32, #tpu.memory_space<vmem>>, vector<8x1024xf32>
    %1 = arith.truncf %0 : vector<8x1024xf32> to vector<8x1024xbf16>
    %c0_1 = arith.constant 0 : index
    %c0_2 = arith.constant 0 : index
    %2 = vector.load %arg2[%c0_1, %c0_2] : memref<1024x512xbf16, #tpu.memory_space<vmem>>, vector<1024x512xbf16>
    %cst = arith.constant dense<0.000000e+00> : vector<8x512xf32>
    %3 = tpu.matmul %1, %2, %cst {dimension_numbers = #tpu.dot_dimension_numbers<[1], [0], [0], [1], [0, 0, 1, 1], [], []>} : vector<8x1024xbf16>, vector<1024x512xbf16>, vector<8x512xf32> -> vector<8x512xf32>
    %c0_3 = arith.constant 0 : index
    %c0_4 = arith.constant 0 : index
    %4 = vector.load %arg3[%c0_3, %c0_4] : memref<1x512xf32, #tpu.memory_space<vmem>>, vector<1x512xf32>
    %5 = vector.broadcast %4 : vector<1x512xf32> to vector<8x512xf32>
    %6 = arith.addf %3, %5 : vector<8x512xf32>
    %cst_5 = arith.constant 2.000000e-01 : f32
    %7 = vector.broadcast %cst_5 : f32 to vector<8x512xf32>
    %8 = arith.mulf %7, %6 : vector<8x512xf32>
    %9 = arith.maximumf %6, %8 : vector<8x512xf32>
    %10 = arith.truncf %9 : vector<8x512xf32> to vector<8x512xbf16>
    %c0_6 = arith.constant 0 : index
    %c0_7 = arith.constant 0 : index
    %11 = vector.load %arg4[%c0_6, %c0_7] : memref<512x256xbf16, #tpu.memory_space<vmem>>, vector<512x256xbf16>
    %cst_8 = arith.constant dense<0.000000e+00> : vector<8x256xf32>
    %12 = tpu.matmul %10, %11, %cst_8 {dimension_numbers = #tpu.dot_dimension_numbers<[1], [0], [0], [1], [0, 0, 1, 1], [], []>} : vector<8x512xbf16>, vector<512x256xbf16>, vector<8x256xf32> -> vector<8x256xf32>
    %c0_9 = arith.constant 0 : index
    %c0_10 = arith.constant 0 : index
    %13 = vector.load %arg5[%c0_9, %c0_10] : memref<1x256xf32, #tpu.memory_space<vmem>>, vector<1x256xf32>
    %14 = vector.broadcast %13 : vector<1x256xf32> to vector<8x256xf32>
    %15 = arith.addf %12, %14 : vector<8x256xf32>
    %cst_11 = arith.constant 2.000000e-01 : f32
    %16 = vector.broadcast %cst_11 : f32 to vector<8x256xf32>
    %17 = arith.mulf %16, %15 : vector<8x256xf32>
    %18 = arith.maximumf %15, %17 : vector<8x256xf32>
    %c0_12 = arith.constant 0 : index
    %c0_13 = arith.constant 0 : index
    %19 = vector.load %arg6[%c0_12, %c0_13] : memref<1x256xbf16, #tpu.memory_space<vmem>>, vector<1x256xbf16>
    %20 = arith.extf %19 : vector<1x256xbf16> to vector<1x256xf32>
    "tpu.trace_start"() <{level = 10 : i32, message = "ok,bk->ob"}> : () -> ()
    %cst_14 = arith.constant dense<0.000000e+00> : vector<1x8xf32>
    %21 = tpu.matmul %20, %18, %cst_14 {dimension_numbers = #tpu.dot_dimension_numbers<[1], [1], [0], [0], [0, 0, 1, 0], [], []>} : vector<1x256xf32>, vector<8x256xf32>, vector<1x8xf32> -> vector<1x8xf32>
    "tpu.trace_stop"() : () -> ()
    %c0_15 = arith.constant 0 : index
    %c0_16 = arith.constant 0 : index
    %22 = memref.load %arg7[%c0_15, %c0_16] : memref<1x1xf32, #tpu.memory_space<smem>>
    %23 = vector.broadcast %22 : f32 to vector<1x8xf32>
    %24 = arith.addf %21, %23 : vector<1x8xf32>
    %cst_17 = arith.constant 0.000000e+00 : f32
    %25 = vector.broadcast %cst_17 : f32 to vector<1x8xf32>
    %26 = arith.subf %25, %24 : vector<1x8xf32>
    %27 = math.exp %26 : vector<1x8xf32>
    %cst_18 = arith.constant 1.000000e+00 : f32
    %28 = vector.broadcast %cst_18 : f32 to vector<1x8xf32>
    %29 = arith.addf %28, %27 : vector<1x8xf32>
    %30 = tpu.reciprocal %29 {approx = true} : vector<1x8xf32> -> vector<1x8xf32>
    %c0_19 = arith.constant 0 : index
    %c0_20 = arith.constant 0 : index
    %31 = vector.load %arg8[%c0_19, %c0_20] : memref<1x8xf32, #tpu.memory_space<vmem>>, vector<1x8xf32>
    tpu.vector_store %arg8[%c0_19, %c0_20], %30 {strides = array<i32>} : memref<1x8xf32, #tpu.memory_space<vmem>>, vector<1x8xf32>,
    return
  }
  func.func @transform_0(%arg0: i32) -> (i32, i32) {
    %c0_i32 = arith.constant 0 : i32
    %c0_i32_0 = arith.constant 0 : i32
    return %arg0, %c0_i32 : i32, i32
  }
  func.func @transform_1(%arg0: i32) -> (i32, i32) {
    %c0_i32 = arith.constant 0 : i32
    %c0_i32_0 = arith.constant 0 : i32
    %c0_i32_1 = arith.constant 0 : i32
    return %c0_i32, %c0_i32_0 : i32, i32
  }
  func.func @transform_2(%arg0: i32) -> (i32, i32) {
    %c0_i32 = arith.constant 0 : i32
    %c0_i32_0 = arith.constant 0 : i32
    %c0_i32_1 = arith.constant 0 : i32
    return %c0_i32, %c0_i32_0 : i32, i32
  }
  func.func @transform_3(%arg0: i32) -> (i32, i32) {
    %c0_i32 = arith.constant 0 : i32
    %c0_i32_0 = arith.constant 0 : i32
    %c0_i32_1 = arith.constant 0 : i32
    return %c0_i32, %c0_i32_0 : i32, i32
  }
  func.func @transform_4(%arg0: i32) -> (i32, i32) {
    %c0_i32 = arith.constant 0 : i32
    %c0_i32_0 = arith.constant 0 : i32
    %c0_i32_1 = arith.constant 0 : i32
    return %c0_i32, %c0_i32_0 : i32, i32
  }
  func.func @transform_5(%arg0: i32) -> (i32, i32) {
    %c0_i32 = arith.constant 0 : i32
    %c0_i32_0 = arith.constant 0 : i32
    %c0_i32_1 = arith.constant 0 : i32
    return %c0_i32, %c0_i32_0 : i32, i32
  }
  func.func @transform_6(%arg0: i32) -> (i32, i32) {
    %c0_i32 = arith.constant 0 : i32
    %c0_i32_0 = arith.constant 0 : i32
    %c0_i32_1 = arith.constant 0 : i32
    return %c0_i32, %c0_i32_0 : i32, i32
  }
  func.func @transform_7(%arg0: i32) -> (i32, i32) {
    %c0_i32 = arith.constant 0 : i32
    %c0_i32_0 = arith.constant 0 : i32
    return %c0_i32, %arg0 : i32, i32
  }
}

</mosaic_0001>

<bundles_post_ra>
// kernel: discriminator_forward.1
= control target key start
LH: loop header
LB: loop body
LE: loop exit
PB: predicated region body
PF: predicated region fallthrough
CT: control target
= control target key end

     0   :  { %13 = vsyncpa [#allocation4], 0  ;;  %s3601_s0 = inlined_call_operand.vmem [shape: f32[8,1024], index: 0, kind: input, shape index: {}]   ;;  %s3602_s1 = inlined_call_operand.hbm [shape: bf16[1024,512], index: 1, kind: input, shape index: {}]   ;;  %s3603_s2 = inlined_call_operand.vmem [shape: f32[1,512], index: 2, kind: input, shape index: {}]   ;;  %s3604_s3 = inlined_call_operand.hbm [shape: bf16[512,256], index: 3, kind: input, shape index: {}]   ;;  %s3605_s4 = inlined_call_operand.vmem [shape: f32[1,256], index: 4, kind: input, shape index: {}]   ;;  %s3606_s5 = inlined_call_operand.vmem [shape: bf16[1,256], index: 5, kind: input, shape index: {}]   ;;  %s3607_s6 = inlined_call_operand.<no memory space> [shape: f32[1,1], index: 6, kind: input, shape index: {}]   ;;  %s3608_s7 = inlined_call_operand.vmem [shape: f32[1,8], index: 7, kind: output, shape index: {}]  }
   0x1   :  { %14 = vsyncpa [#allocation6], 0  ;;  %s3439_s24 = smov [#allocation3]   ;;  %s3391_s28 = scalar_lea.hbm %s3602_s1, 32768 }
   0x2   :  { %s22_s25 = sshll.u32 %s3439_s24, 4  ;;  %p3392_p0 = scmp.ne.s32.totalorder %s3602_s1, %s3391_s28  ;;  %s23_s25 = int_to_ptr.vmem [resolvable:$true] %s22_s25 }
   0x3   :  { %p3395_p1 = scmp.lt.u32.totalorder %s3391_s28, %s3602_s1 }
   0x5   :  { %p3397_p2 = pnand %p3395_p1, %p3392_p0 }
   0x7   :  { %3400 = shalt.err (!%p3397_p2)
}
   0x8   :  { %s3401_s10 = scalar_lea.vmem %s23_s25, 32768  ;;  %p3406_p4 = scmp.lt.s32.totalorder %s23_s25, %s23_s25 }
   0x9   :  { %p3402_p3 = scmp.ne.s32.totalorder %s23_s25, %s3401_s10  ;;  %p3407_p5 = scmp.lt.s32.totalorder %s3401_s10, %s3401_s10 }
   0xb   :  { %p3408_p6 = por %p3407_p5, %p3406_p4 }
   0xd   :  { %p3409_p7 = pnand %p3408_p6, %p3402_p3 }
   0xf   :  { %3412 = shalt.err (!%p3409_p7)
}
  0x10   :  { %s3440_s11 = smov 256   ;;  %s3441_s12 = smov 16  }
  0x11   :  { %28 = dma.hbm_to_vmem [thread:$0]  %s3602_s1, 32768, %s23_s25, [#allocation4], %s3440_s11, %s3440_s11, %s3441_s12  }
  0x12   :  { %s3442_s15 = smov [#allocation5]   ;;  %s3413_s19 = scalar_lea.hbm %s3604_s3, 8192 }
  0x13   :  { %s36_s16 = sshll.u32 %s3442_s15, 4  ;;  %p3414_p8 = scmp.ne.s32.totalorder %s3604_s3, %s3413_s19  ;;  %s37_s16 = int_to_ptr.vmem [resolvable:$true] %s36_s16 }
  0x14   :  { %p3417_p9 = scmp.lt.u32.totalorder %s3413_s19, %s3604_s3 }
  0x16   :  { %p3419_p10 = pnand %p3417_p9, %p3414_p8 }
  0x18   :  { %3422 = shalt.err (!%p3419_p10)
}
  0x19   :  { %s3423_s24 = scalar_lea.vmem %s37_s16, 8192  ;;  %p3428_p12 = scmp.lt.s32.totalorder %s37_s16, %s37_s16 }
  0x1a   :  { %p3424_p11 = scmp.ne.s32.totalorder %s37_s16, %s3423_s24  ;;  %p3429_p13 = scmp.lt.s32.totalorder %s3423_s24, %s3423_s24 }
  0x1c   :  { %p3430_p0 = por %p3429_p13, %p3428_p12 }
  0x1e   :  { %p3431_p1 = pnand %p3430_p0, %p3424_p11 }
  0x20   :  { %3434 = shalt.err (!%p3431_p1)
}
  0x21   :  { %s3443_s1 = smov 128   ;;  %s3444_s25 = smov 8  }
  0x22   :  { %42 = dma.hbm_to_vmem [thread:$0]  %s3604_s3, 8192, %s37_s16, [#allocation6], %s3443_s1, %s3443_s1, %s3444_s25  }
  0x23   :  { %3435 = dma.done.wait [#allocation4], 32768  }
  0x24   :  { %3436 = vsyncadd [#allocation4], 4294934528 }
  0x25   :  { %3437 = dma.done.wait [#allocation6], 8192  }
  0x26   :  { %3438 = vsyncadd [#allocation6], 4294959104  ;;  %v2907_v0 = vld [vmem:[#allocation3 + $0x4] ss:$16 sps:$4 sm:$0xff]   ;;  %v2911_v2 = vld [vmem:[#allocation3] ss:$16 sps:$4 sm:$0xff]  }
  0x27   :  { %v2909_v1 = vld [vmem:[#allocation3 + $0x204] ss:$16 sps:$4 sm:$0xff]   ;;  %1629 = vmatprep.subr.bf16.mxu1 %v2907_v0  ;;  %v2912_v3 = vld [vmem:[#allocation3 + $0x200] ss:$16 sps:$4 sm:$0xff]   ;;  %v56_v46 = vld [vmem:[%s3601_s0 + $0x8] sm:$0xff]  ;;  %vm2541_vm0 = vcmask 57344  }
  0x28   :  { %1670 = vmatprep.subr.bf16.mxu0 %v2909_v1  ;;  %v2913_v4 = vld [vmem:[#allocation3 + $0x24] ss:$16 sps:$4 sm:$0xff]   ;;  %1630 = vmatpush1.bf16.msra.mxu1 %v2911_v2  ;;  %v2917_v6 = vld [vmem:[#allocation3 + $0x20] ss:$16 sps:$4 sm:$0xff]   ;;  %v3512_v48 = vpack.c.bf16 %v56_v46, %v56_v46  ;;  %v58_v49 = vld [vmem:[%s3601_s0 + $0x18] sm:$0xff] }
  0x29   :  { %1671 = vmatpush1.bf16.msra.mxu0 %v2912_v3  ;;  %v2915_v5 = vld [vmem:[#allocation3 + $0x224] ss:$16 sps:$4 sm:$0xff]   ;;  %1631 = vmatprep.subr.bf16.mxu1 %v2913_v4  ;;  %v2918_v7 = vld [vmem:[#allocation3 + $0x220] ss:$16 sps:$4 sm:$0xff]   ;;  %v3517_v52 = vpack.c.bf16 %v58_v49, %v58_v49  ;;  %v3060_v49 = vld [vmem:[#allocation3 + $0x128] ss:$16 sps:$4 sm:$0xff]  }
  0x2a   :  { %1672 = vmatprep.subr.bf16.mxu0 %v2915_v5  ;;  %v2919_v8 = vld [vmem:[#allocation3 + $0x44] ss:$16 sps:$4 sm:$0xff]   ;;  %v2923_v10 = vld [vmem:[#allocation3 + $0x40] ss:$16 sps:$4 sm:$0xff]   ;;  %1661 = vmatprep.mubr.bf16.mxu1 %v3512_v48 }
  0x2b   :  { %v2921_v9 = vld [vmem:[#allocation3 + $0x244] ss:$16 sps:$4 sm:$0xff]   ;;  %v2924_v11 = vld [vmem:[#allocation3 + $0x240] ss:$16 sps:$4 sm:$0xff]   ;;  %1702 = vmatprep.mubr.bf16.mxu0 %v3517_v52 }
  0x2c   :  { %1632 = vmatpush1.bf16.msra.mxu1 %v2917_v6  ;;  %v2925_v12 = vld [vmem:[#allocation3 + $0x64] ss:$16 sps:$4 sm:$0xff]   ;;  %v2929_v14 = vld [vmem:[#allocation3 + $0x60] ss:$16 sps:$4 sm:$0xff]  }
  0x2d   :  { %1673 = vmatpush1.bf16.msra.mxu0 %v2918_v7  ;;  %1633 = vmatprep.subr.bf16.mxu1 %v2919_v8  ;;  %v2927_v13 = vld [vmem:[#allocation3 + $0x264] ss:$16 sps:$4 sm:$0xff]   ;;  %v2930_v15 = vld [vmem:[#allocation3 + $0x260] ss:$16 sps:$4 sm:$0xff]   ;;  %v3008_v7 = vld [vmem:[#allocation3 + $0xc] ss:$16 sps:$4 sm:$0xff]  }
  0x2e   :  { %1674 = vmatprep.subr.bf16.mxu0 %v2921_v9  ;;  %v2931_v16 = vld [vmem:[#allocation3 + $0x84] ss:$16 sps:$4 sm:$0xff]   ;;  %v2935_v18 = vld [vmem:[#allocation3 + $0x80] ss:$16 sps:$4 sm:$0xff]  }
  0x2f   :  { %v2933_v17 = vld [vmem:[#allocation3 + $0x284] ss:$16 sps:$4 sm:$0xff]   ;;  %v2936_v19 = vld [vmem:[#allocation3 + $0x280] ss:$16 sps:$4 sm:$0xff]  }
  0x30   :  { %1634 = vmatpush1.bf16.msra.mxu1 %v2923_v10  ;;  %v2937_v20 = vld [vmem:[#allocation3 + $0xa4] ss:$16 sps:$4 sm:$0xff]   ;;  %v2941_v22 = vld [vmem:[#allocation3 + $0xa0] ss:$16 sps:$4 sm:$0xff]   ;;  %v3006_v10 = vld [vmem:[#allocation3 + $0x8] ss:$16 sps:$4 sm:$0xff]  }
  0x31   :  { %1675 = vmatpush1.bf16.msra.mxu0 %v2924_v11  ;;  %1635 = vmatprep.subr.bf16.mxu1 %v2925_v12  ;;  %v2939_v21 = vld [vmem:[#allocation3 + $0x2a4] ss:$16 sps:$4 sm:$0xff]   ;;  %v2942_v23 = vld [vmem:[#allocation3 + $0x2a0] ss:$16 sps:$4 sm:$0xff]  }
  0x32   :  { %1676 = vmatprep.subr.bf16.mxu0 %v2927_v13  ;;  %v2943_v24 = vld [vmem:[#allocation3 + $0xc4] ss:$16 sps:$4 sm:$0xff]   ;;  %v2947_v26 = vld [vmem:[#allocation3 + $0xc0] ss:$16 sps:$4 sm:$0xff]   ;;  %v3014_v13 = vld [vmem:[#allocation3 + $0x2c] ss:$16 sps:$4 sm:$0xff]  }
  0x33   :  { %v2945_v25 = vld [vmem:[#allocation3 + $0x2c4] ss:$16 sps:$4 sm:$0xff]   ;;  %v2948_v27 = vld [vmem:[#allocation3 + $0x2c0] ss:$16 sps:$4 sm:$0xff]  }
  0x34   :  { %1636 = vmatpush1.bf16.msra.mxu1 %v2929_v14  ;;  %v2949_v28 = vld [vmem:[#allocation3 + $0xe4] ss:$16 sps:$4 sm:$0xff]   ;;  %v2953_v30 = vld [vmem:[#allocation3 + $0xe0] ss:$16 sps:$4 sm:$0xff]  }
  0x35   :  { %1677 = vmatpush1.bf16.msra.mxu0 %v2930_v15  ;;  %1637 = vmatprep.subr.bf16.mxu1 %v2931_v16  ;;  %v2951_v29 = vld [vmem:[#allocation3 + $0x2e4] ss:$16 sps:$4 sm:$0xff]   ;;  %v2954_v31 = vld [vmem:[#allocation3 + $0x2e0] ss:$16 sps:$4 sm:$0xff]   ;;  %v3012_v15 = vld [vmem:[#allocation3 + $0x28] ss:$16 sps:$4 sm:$0xff]  }
  0x36   :  { %1678 = vmatprep.subr.bf16.mxu0 %v2933_v17  ;;  %v2955_v32 = vld [vmem:[#allocation3 + $0x104] ss:$16 sps:$4 sm:$0xff]   ;;  %v2959_v34 = vld [vmem:[#allocation3 + $0x100] ss:$16 sps:$4 sm:$0xff]   ;;  %v3020_v17 = vld [vmem:[#allocation3 + $0x4c] ss:$16 sps:$4 sm:$0xff]  }
  0x37   :  { %v2957_v33 = vld [vmem:[#allocation3 + $0x304] ss:$16 sps:$4 sm:$0xff]   ;;  %v2960_v35 = vld [vmem:[#allocation3 + $0x300] ss:$16 sps:$4 sm:$0xff]  }
  0x38   :  { %1638 = vmatpush1.bf16.msra.mxu1 %v2935_v18  ;;  %v2961_v36 = vld [vmem:[#allocation3 + $0x124] ss:$16 sps:$4 sm:$0xff]   ;;  %v2965_v38 = vld [vmem:[#allocation3 + $0x120] ss:$16 sps:$4 sm:$0xff]  }
  0x39   :  { %1679 = vmatpush1.bf16.msra.mxu0 %v2936_v19  ;;  %1639 = vmatprep.subr.bf16.mxu1 %v2937_v20  ;;  %v2963_v37 = vld [vmem:[#allocation3 + $0x324] ss:$16 sps:$4 sm:$0xff]   ;;  %v2966_v39 = vld [vmem:[#allocation3 + $0x320] ss:$16 sps:$4 sm:$0xff]   ;;  %v3018_v19 = vld [vmem:[#allocation3 + $0x48] ss:$16 sps:$4 sm:$0xff]  }
  0x3a   :  { %1680 = vmatprep.subr.bf16.mxu0 %v2939_v21  ;;  %v2967_v40 = vld [vmem:[#allocation3 + $0x144] ss:$16 sps:$4 sm:$0xff]   ;;  %v2971_v42 = vld [vmem:[#allocation3 + $0x140] ss:$16 sps:$4 sm:$0xff]   ;;  %v3026_v21 = vld [vmem:[#allocation3 + $0x6c] ss:$16 sps:$4 sm:$0xff]  }
  0x3b   :  { %v2969_v41 = vld [vmem:[#allocation3 + $0x344] ss:$16 sps:$4 sm:$0xff]   ;;  %v2972_v43 = vld [vmem:[#allocation3 + $0x340] ss:$16 sps:$4 sm:$0xff]  }
  0x3c   :  { %1640 = vmatpush1.bf16.msra.mxu1 %v2941_v22  ;;  %v2973_v44 = vld [vmem:[#allocation3 + $0x164] ss:$16 sps:$4 sm:$0xff]   ;;  %v2977_v47 = vld [vmem:[#allocation3 + $0x160] ss:$16 sps:$4 sm:$0xff]  }
  0x3d   :  { %1681 = vmatpush1.bf16.msra.mxu0 %v2942_v23  ;;  %1641 = vmatprep.subr.bf16.mxu1 %v2943_v24  ;;  %v2975_v45 = vld [vmem:[#allocation3 + $0x364] ss:$16 sps:$4 sm:$0xff]   ;;  %v2978_v50 = vld [vmem:[#allocation3 + $0x360] ss:$16 sps:$4 sm:$0xff]   ;;  %v3024_v23 = vld [vmem:[#allocation3 + $0x68] ss:$16 sps:$4 sm:$0xff]  }
  0x3e   :  { %1682 = vmatprep.subr.bf16.mxu0 %v2945_v25  ;;  %v2979_v51 = vld [vmem:[#allocation3 + $0x184] ss:$16 sps:$4 sm:$0xff]   ;;  %v2983_v54 = vld [vmem:[#allocation3 + $0x180] ss:$16 sps:$4 sm:$0xff]   ;;  %v3032_v25 = vld [vmem:[#allocation3 + $0x8c] ss:$16 sps:$4 sm:$0xff]  }
  0x3f   :  { %v2981_v53 = vld [vmem:[#allocation3 + $0x384] ss:$16 sps:$4 sm:$0xff]   ;;  %v2984_v55 = vld [vmem:[#allocation3 + $0x380] ss:$16 sps:$4 sm:$0xff]  }
  0x40   :  { %1642 = vmatpush1.bf16.msra.mxu1 %v2947_v26  ;;  %v2985_v56 = vld [vmem:[#allocation3 + $0x1a4] ss:$16 sps:$4 sm:$0xff]   ;;  %v2989_v58 = vld [vmem:[#allocation3 + $0x1a0] ss:$16 sps:$4 sm:$0xff]  }
  0x41   :  { %1683 = vmatpush1.bf16.msra.mxu0 %v2948_v27  ;;  %1643 = vmatprep.subr.bf16.mxu1 %v2949_v28  ;;  %v2987_v57 = vld [vmem:[#allocation3 + $0x3a4] ss:$16 sps:$4 sm:$0xff]   ;;  %v2990_v59 = vld [vmem:[#allocation3 + $0x3a0] ss:$16 sps:$4 sm:$0xff]   ;;  %v3030_v27 = vld [vmem:[#allocation3 + $0x88] ss:$16 sps:$4 sm:$0xff]  }
  0x42   :  { %1684 = vmatprep.subr.bf16.mxu0 %v2951_v29  ;;  %v2991_v60 = vld [vmem:[#allocation3 + $0x1c4] ss:$16 sps:$4 sm:$0xff]   ;;  %v2995_v62 = vld [vmem:[#allocation3 + $0x1c0] ss:$16 sps:$4 sm:$0xff]   ;;  %v3038_v29 = vld [vmem:[#allocation3 + $0xac] ss:$16 sps:$4 sm:$0xff]  }
  0x43   :  { %v2993_v61 = vld [vmem:[#allocation3 + $0x3c4] ss:$16 sps:$4 sm:$0xff]   ;;  %v2996_v63 = vld [vmem:[#allocation3 + $0x3c0] ss:$16 sps:$4 sm:$0xff]  }
  0x44   :  { %1644 = vmatpush1.bf16.msra.mxu1 %v2953_v30  ;;  %v2997_v0 = vld [vmem:[#allocation3 + $0x1e4] ss:$16 sps:$4 sm:$0xff]   ;;  %v3001_v2 = vld [vmem:[#allocation3 + $0x1e0] ss:$16 sps:$4 sm:$0xff]  }
  0x45   :  { %1685 = vmatpush1.bf16.msra.mxu0 %v2954_v31  ;;  %1645 = vmatprep.subr.bf16.mxu1 %v2955_v32  ;;  %v2999_v1 = vld [vmem:[#allocation3 + $0x3e4] ss:$16 sps:$4 sm:$0xff]   ;;  %v3002_v3 = vld [vmem:[#allocation3 + $0x3e0] ss:$16 sps:$4 sm:$0xff]   ;;  %v3036_v31 = vld [vmem:[#allocation3 + $0xa8] ss:$16 sps:$4 sm:$0xff]  }
  0x46   :  { %1686 = vmatprep.subr.bf16.mxu0 %v2957_v33  ;;  %v55_v4 = vld [vmem:[%s3601_s0] sm:$0xff]  ;;  %v57_v6 = vld [vmem:[%s3601_s0 + $0x10] sm:$0xff]  ;;  %v3044_v33 = vld [vmem:[#allocation3 + $0xcc] ss:$16 sps:$4 sm:$0xff]  }
  0x47   :  { %v3005_v5 = vld [vmem:[#allocation3 + $0x404] ss:$16 sps:$4 sm:$0xff]   ;;  %v3527_v8 = vpack.c.bf16 %v55_v4, %v55_v4  ;;  %v3003_v9 = vld [vmem:[#allocation3 + $0x400] ss:$16 sps:$4 sm:$0xff]   ;;  %v3529_v11 = vpack.c.bf16 %v57_v6, %v57_v6  ;;  %v3092_v4 = vld [vmem:[#allocation3 + $0x1cc] ss:$16 sps:$4 sm:$0xff]  }
  0x48   :  { %1646 = vmatpush1.bf16.msra.mxu1 %v2959_v34  ;;  %v3011_v12 = vld [vmem:[#allocation3 + $0x424] ss:$16 sps:$4 sm:$0xff]   ;;  %v3009_v14 = vld [vmem:[#allocation3 + $0x420] ss:$16 sps:$4 sm:$0xff]   ;;  %v60_v34 = vld [vmem:[%s3601_s0 + $0x28] sm:$0xff] }
  0x49   :  { %1687 = vmatpush1.bf16.msra.mxu0 %v2960_v35  ;;  %1647 = vmatprep.subr.bf16.mxu1 %v2961_v36  ;;  %v3017_v16 = vld [vmem:[#allocation3 + $0x444] ss:$16 sps:$4 sm:$0xff]   ;;  %v3015_v18 = vld [vmem:[#allocation3 + $0x440] ss:$16 sps:$4 sm:$0xff]   ;;  %v3537_v36 = vpack.c.bf16 %v60_v34, %v60_v34  ;;  %v3090_v6 = vld [vmem:[#allocation3 + $0x1c8] ss:$16 sps:$4 sm:$0xff]  }
  0x4a   :  { %1688 = vmatprep.subr.bf16.mxu0 %v2963_v37  ;;  %v3023_v20 = vld [vmem:[#allocation3 + $0x464] ss:$16 sps:$4 sm:$0xff]   ;;  %v3021_v22 = vld [vmem:[#allocation3 + $0x460] ss:$16 sps:$4 sm:$0xff]   ;;  %v3042_v37 = vld [vmem:[#allocation3 + $0xc8] ss:$16 sps:$4 sm:$0xff]  }
  0x4b   :  { %v3029_v24 = vld [vmem:[#allocation3 + $0x484] ss:$16 sps:$4 sm:$0xff]   ;;  %v3027_v26 = vld [vmem:[#allocation3 + $0x480] ss:$16 sps:$4 sm:$0xff]  }
  0x4c   :  { %1648 = vmatpush1.bf16.msra.mxu1 %v2965_v38  ;;  %v3035_v28 = vld [vmem:[#allocation3 + $0x4a4] ss:$16 sps:$4 sm:$0xff]   ;;  %v3033_v30 = vld [vmem:[#allocation3 + $0x4a0] ss:$16 sps:$4 sm:$0xff]  }
  0x4d   :  { %1689 = vmatpush1.bf16.msra.mxu0 %v2966_v39  ;;  %1649 = vmatprep.subr.bf16.mxu1 %v2967_v40  ;;  %v3041_v32 = vld [vmem:[#allocation3 + $0x4c4] ss:$16 sps:$4 sm:$0xff]   ;;  %v3039_v35 = vld [vmem:[#allocation3 + $0x4c0] ss:$16 sps:$4 sm:$0xff]   ;;  %v3050_v39 = vld [vmem:[#allocation3 + $0xec] ss:$16 sps:$4 sm:$0xff]  }
  0x4e   :  { %1690 = vmatprep.subr.bf16.mxu0 %v2969_v41  ;;  %v3047_v38 = vld [vmem:[#allocation3 + $0x4e4] ss:$16 sps:$4 sm:$0xff]   ;;  %v3045_v40 = vld [vmem:[#allocation3 + $0x4e0] ss:$16 sps:$4 sm:$0xff]   ;;  %v3048_v41 = vld [vmem:[#allocation3 + $0xe8] ss:$16 sps:$4 sm:$0xff]  }
  0x4f   :  { %v3059_v46 = vld [vmem:[#allocation3 + $0x524] ss:$16 sps:$4 sm:$0xff]   ;;  %v3123_v34 = vld [vmem:[#allocation3 + $0x680] ss:$16 sps:$4 sm:$0xff]  }
  0x50   :  { %1650 = vmatpush1.bf16.msra.mxu1 %v2971_v42  ;;  %v3053_v42 = vld [vmem:[#allocation3 + $0x504] ss:$16 sps:$4 sm:$0xff]  }
  0x51   :  { %1691 = vmatpush1.bf16.msra.mxu0 %v2972_v43  ;;  %1651 = vmatprep.subr.bf16.mxu1 %v2973_v44  ;;  %v3056_v43 = vld [vmem:[#allocation3 + $0x10c] ss:$16 sps:$4 sm:$0xff]   ;;  %v3051_v44 = vld [vmem:[#allocation3 + $0x500] ss:$16 sps:$4 sm:$0xff]  }
  0x52   :  { %1692 = vmatprep.subr.bf16.mxu0 %v2975_v45  ;;  %v3054_v45 = vld [vmem:[#allocation3 + $0x108] ss:$16 sps:$4 sm:$0xff]  }
  0x54   :  { %1652 = vmatpush1.bf16.msra.mxu1 %v2977_v47  ;;  %v3062_v47 = vld [vmem:[#allocation3 + $0x12c] ss:$16 sps:$4 sm:$0xff]  }
  0x55   :  { %1693 = vmatpush1.bf16.msra.mxu0 %v2978_v50  ;;  %1653 = vmatprep.subr.bf16.mxu1 %v2979_v51  ;;  %v3065_v50 = vld [vmem:[#allocation3 + $0x544] ss:$16 sps:$4 sm:$0xff]   ;;  %v3068_v51 = vld [vmem:[#allocation3 + $0x14c] ss:$16 sps:$4 sm:$0xff]  }
  0x56   :  { %1694 = vmatprep.subr.bf16.mxu0 %v2981_v53  ;;  %v3063_v53 = vld [vmem:[#allocation3 + $0x540] ss:$16 sps:$4 sm:$0xff]  }
  0x58   :  { %1654 = vmatpush1.bf16.msra.mxu1 %v2983_v54  ;;  %v3066_v54 = vld [vmem:[#allocation3 + $0x148] ss:$16 sps:$4 sm:$0xff]  }
  0x59   :  { %1695 = vmatpush1.bf16.msra.mxu0 %v2984_v55  ;;  %1655 = vmatprep.subr.bf16.mxu1 %v2985_v56  ;;  %v3071_v55 = vld [vmem:[#allocation3 + $0x564] ss:$16 sps:$4 sm:$0xff]   ;;  %v3074_v56 = vld [vmem:[#allocation3 + $0x16c] ss:$16 sps:$4 sm:$0xff]  }
  0x5a   :  { %1696 = vmatprep.subr.bf16.mxu0 %v2987_v57  ;;  %v3069_v57 = vld [vmem:[#allocation3 + $0x560] ss:$16 sps:$4 sm:$0xff]  }
  0x5c   :  { %1656 = vmatpush1.bf16.msra.mxu1 %v2989_v58  ;;  %v3072_v58 = vld [vmem:[#allocation3 + $0x168] ss:$16 sps:$4 sm:$0xff]  }
  0x5d   :  { %1697 = vmatpush1.bf16.msra.mxu0 %v2990_v59  ;;  %1657 = vmatprep.subr.bf16.mxu1 %v2991_v60  ;;  %v3077_v59 = vld [vmem:[#allocation3 + $0x584] ss:$16 sps:$4 sm:$0xff]   ;;  %v3080_v60 = vld [vmem:[#allocation3 + $0x18c] ss:$16 sps:$4 sm:$0xff]  }
  0x5e   :  { %1698 = vmatprep.subr.bf16.mxu0 %v2993_v61  ;;  %v3075_v61 = vld [vmem:[#allocation3 + $0x580] ss:$16 sps:$4 sm:$0xff]  }
  0x60   :  { %1658 = vmatpush1.bf16.msra.mxu1 %v2995_v62  ;;  %v3078_v62 = vld [vmem:[#allocation3 + $0x188] ss:$16 sps:$4 sm:$0xff]  }
  0x61   :  { %1699 = vmatpush1.bf16.msra.mxu0 %v2996_v63  ;;  %1659 = vmatprep.subr.bf16.mxu1 %v2997_v0  ;;  %v3083_v63 = vld [vmem:[#allocation3 + $0x5a4] ss:$16 sps:$4 sm:$0xff]   ;;  %v3086_v0 = vld [vmem:[#allocation3 + $0x1ac] ss:$16 sps:$4 sm:$0xff]  }
  0x62   :  { %1700 = vmatprep.subr.bf16.mxu0 %v2999_v1  ;;  %v3081_v1 = vld [vmem:[#allocation3 + $0x5a0] ss:$16 sps:$4 sm:$0xff]  }
  0x64   :  { %1660 = vmatpush1.bf16.msra.mxu1 %v3001_v2  ;;  %v3084_v2 = vld [vmem:[#allocation3 + $0x1a8] ss:$16 sps:$4 sm:$0xff]  }
  0x65   :  { %1701 = vmatpush1.bf16.msra.mxu0 %v3002_v3  ;;  %1793 = vmatprep.subr.bf16.mxu1 %v3008_v7  ;;  %v3089_v3 = vld [vmem:[#allocation3 + $0x5c4] ss:$16 sps:$4 sm:$0xff]  }
  0x66   :  { %1711 = vmatprep.subr.bf16.mxu0 %v3005_v5  ;;  %v3087_v5 = vld [vmem:[#allocation3 + $0x5c0] ss:$16 sps:$4 sm:$0xff]   ;;  %v3095_v7 = vld [vmem:[#allocation3 + $0x5e4] ss:$16 sps:$4 sm:$0xff]  }
  0x67   :  { %1662 = vmatmul.mubr.bf16.vlgmr.msra.gmra.mrb[0].mxu1 %v3527_v8 }
  0x68   :  { %1703 = vmatmul.mubr.bf16.vlgmr.msra.gmra.mrb[0].mxu0 %v3529_v11  ;;  %1794 = vmatpush1.bf16.msra.mxu1 %v3006_v10  ;;  %v3093_v10 = vld [vmem:[#allocation3 + $0x5e0] ss:$16 sps:$4 sm:$0xff]  }
  0x69   :  { %1712 = vmatpush1.bf16.msra.mxu0 %v3003_v9  ;;  %1795 = vmatprep.subr.bf16.mxu1 %v3014_v13  ;;  %v3098_v9 = vld [vmem:[#allocation3 + $0x1ec] ss:$16 sps:$4 sm:$0xff]   ;;  %v59_v13 = vld [vmem:[%s3601_s0 + $0x20] sm:$0xff] }
  0x6a   :  { %1713 = vmatprep.subr.bf16.mxu0 %v3011_v12  ;;  %1825 = vmatprep.mubr.bf16.mxu1 %v3512_v48  ;;  %v3057_v48 = vld [vmem:[#allocation3 + $0x520] ss:$16 sps:$4 sm:$0xff]   ;;  %v3096_v12 = vld [vmem:[#allocation3 + $0x1e8] ss:$16 sps:$4 sm:$0xff]  }
  0x6b   :  { %1743 = vmatprep.mubr.bf16.mxu0 %v3537_v36 }
  0x6c   :  { %1796 = vmatpush1.bf16.msra.mxu1 %v3012_v15  ;;  %v3104_v15 = vld [vmem:[#allocation3 + $0x20c] ss:$16 sps:$4 sm:$0xff]  }
  0x6d   :  { %1714 = vmatpush1.bf16.msra.mxu0 %v3009_v14  ;;  %1797 = vmatprep.subr.bf16.mxu1 %v3020_v17  ;;  %v3101_v14 = vld [vmem:[#allocation3 + $0x604] ss:$16 sps:$4 sm:$0xff]   ;;  %v3099_v17 = vld [vmem:[#allocation3 + $0x600] ss:$16 sps:$4 sm:$0xff]  }
  0x6e   :  { %1715 = vmatprep.subr.bf16.mxu0 %v3017_v16  ;;  %v3543_v16 = vpack.c.bf16 %v59_v13, %v59_v13  ;;  %v3183_v13 = vld [vmem:[#allocation3 + $0x7c0] ss:$16 sps:$4 sm:$0xff]  }
  0x70   :  { %1798 = vmatpush1.bf16.msra.mxu1 %v3018_v19  ;;  %v3107_v19 = vld [vmem:[#allocation3 + $0x624] ss:$16 sps:$4 sm:$0xff]  }
  0x71   :  { %1716 = vmatpush1.bf16.msra.mxu0 %v3015_v18  ;;  %1799 = vmatprep.subr.bf16.mxu1 %v3026_v21  ;;  %v3102_v18 = vld [vmem:[#allocation3 + $0x208] ss:$16 sps:$4 sm:$0xff]  }
  0x72   :  { %1717 = vmatprep.subr.bf16.mxu0 %v3023_v20  ;;  %v3110_v20 = vld [vmem:[#allocation3 + $0x22c] ss:$16 sps:$4 sm:$0xff]  }
  0x73   :  { %v62_v21 = vld [vmem:[%s3601_s0 + $0x38] sm:$0xff] }
  0x74   :  { %1800 = vmatpush1.bf16.msra.mxu1 %v3024_v23  ;;  %v3108_v23 = vld [vmem:[#allocation3 + $0x228] ss:$16 sps:$4 sm:$0xff]  }
  0x75   :  { %1718 = vmatpush1.bf16.msra.mxu0 %v3021_v22  ;;  %1801 = vmatprep.subr.bf16.mxu1 %v3032_v25  ;;  %v3105_v22 = vld [vmem:[#allocation3 + $0x620] ss:$16 sps:$4 sm:$0xff]   ;;  %v3113_v25 = vld [vmem:[#allocation3 + $0x644] ss:$16 sps:$4 sm:$0xff]  }
  0x76   :  { %1719 = vmatprep.subr.bf16.mxu0 %v3029_v24  ;;  %v3550_v24 = vpack.c.bf16 %v62_v21, %v62_v21  ;;  %v3197_v21 = vld [vmem:[#allocation3 + $0x40c] ss:$16 sps:$4 sm:$0xff]  }
  0x78   :  { %1802 = vmatpush1.bf16.msra.mxu1 %v3030_v27  ;;  %v3111_v27 = vld [vmem:[#allocation3 + $0x640] ss:$16 sps:$4 sm:$0xff]  }
  0x79   :  { %1720 = vmatpush1.bf16.msra.mxu0 %v3027_v26  ;;  %1803 = vmatprep.subr.bf16.mxu1 %v3038_v29  ;;  %v3116_v26 = vld [vmem:[#allocation3 + $0x24c] ss:$16 sps:$4 sm:$0xff]   ;;  %v3119_v29 = vld [vmem:[#allocation3 + $0x664] ss:$16 sps:$4 sm:$0xff]  }
  0x7a   :  { %1721 = vmatprep.subr.bf16.mxu0 %v3035_v28  ;;  %v3114_v28 = vld [vmem:[#allocation3 + $0x248] ss:$16 sps:$4 sm:$0xff]  }
  0x7c   :  { %1804 = vmatpush1.bf16.msra.mxu1 %v3036_v31  ;;  %v3120_v31 = vld [vmem:[#allocation3 + $0x268] ss:$16 sps:$4 sm:$0xff]  }
  0x7d   :  { %1722 = vmatpush1.bf16.msra.mxu0 %v3033_v30  ;;  %1805 = vmatprep.subr.bf16.mxu1 %v3044_v33  ;;  %v3117_v30 = vld [vmem:[#allocation3 + $0x660] ss:$16 sps:$4 sm:$0xff]   ;;  %v3128_v33 = vld [vmem:[#allocation3 + $0x28c] ss:$16 sps:$4 sm:$0xff]  }
  0x7e   :  { %1723 = vmatprep.subr.bf16.mxu0 %v3041_v32  ;;  %v3125_v32 = vld [vmem:[#allocation3 + $0x684] ss:$16 sps:$4 sm:$0xff]  }
  0x80   :  { %1806 = vmatpush1.bf16.msra.mxu1 %v3042_v37  ;;  %v3134_v37 = vld [vmem:[#allocation3 + $0x2ac] ss:$16 sps:$4 sm:$0xff]  }
  0x81   :  { %1724 = vmatpush1.bf16.msra.mxu0 %v3039_v35  ;;  %1807 = vmatprep.subr.bf16.mxu1 %v3050_v39  ;;  %v3126_v35 = vld [vmem:[#allocation3 + $0x288] ss:$16 sps:$4 sm:$0xff]  }
  0x82   :  { %1725 = vmatprep.subr.bf16.mxu0 %v3047_v38  ;;  %v3129_v38 = vld [vmem:[#allocation3 + $0x6a0] ss:$16 sps:$4 sm:$0xff]   ;;  %v3132_v39 = vld [vmem:[#allocation3 + $0x2a8] ss:$16 sps:$4 sm:$0xff]  }
  0x84   :  { %1808 = vmatpush1.bf16.msra.mxu1 %v3048_v41  ;;  %v3140_v41 = vld [vmem:[#allocation3 + $0x2cc] ss:$16 sps:$4 sm:$0xff]  }
  0x85   :  { %1726 = vmatpush1.bf16.msra.mxu0 %v3045_v40  ;;  %1809 = vmatprep.subr.bf16.mxu1 %v3056_v43  ;;  %v3137_v40 = vld [vmem:[#allocation3 + $0x6c4] ss:$16 sps:$4 sm:$0xff]   ;;  %v3138_v43 = vld [vmem:[#allocation3 + $0x2c8] ss:$16 sps:$4 sm:$0xff]  }
  0x86   :  { %1727 = vmatprep.subr.bf16.mxu0 %v3053_v42  ;;  %v3135_v42 = vld [vmem:[#allocation3 + $0x6c0] ss:$16 sps:$4 sm:$0xff]  }
  0x88   :  { %1810 = vmatpush1.bf16.msra.mxu1 %v3054_v45  ;;  %v3146_v45 = vld [vmem:[#allocation3 + $0x2ec] ss:$16 sps:$4 sm:$0xff]  }
  0x89   :  { %1728 = vmatpush1.bf16.msra.mxu0 %v3051_v44  ;;  %1811 = vmatprep.subr.bf16.mxu1 %v3062_v47  ;;  %v3143_v44 = vld [vmem:[#allocation3 + $0x6e4] ss:$16 sps:$4 sm:$0xff]   ;;  %v3144_v47 = vld [vmem:[#allocation3 + $0x2e8] ss:$16 sps:$4 sm:$0xff]  }
  0x8a   :  { %1729 = vmatprep.subr.bf16.mxu0 %v3059_v46  ;;  %v3141_v46 = vld [vmem:[#allocation3 + $0x6e0] ss:$16 sps:$4 sm:$0xff]  }
  0x8c   :  { %1812 = vmatpush1.bf16.msra.mxu1 %v3060_v49  ;;  %v3152_v49 = vld [vmem:[#allocation3 + $0x30c] ss:$16 sps:$4 sm:$0xff]  }
  0x8d   :  { %1730 = vmatpush1.bf16.msra.mxu0 %v3057_v48  ;;  %1813 = vmatprep.subr.bf16.mxu1 %v3068_v51  ;;  %v3149_v48 = vld [vmem:[#allocation3 + $0x704] ss:$16 sps:$4 sm:$0xff]   ;;  %v3150_v51 = vld [vmem:[#allocation3 + $0x308] ss:$16 sps:$4 sm:$0xff]  }
  0x8e   :  { %1731 = vmatprep.subr.bf16.mxu0 %v3065_v50  ;;  %v3147_v50 = vld [vmem:[#allocation3 + $0x700] ss:$16 sps:$4 sm:$0xff]  }
  0x90   :  { %1814 = vmatpush1.bf16.msra.mxu1 %v3066_v54  ;;  %v3158_v54 = vld [vmem:[#allocation3 + $0x32c] ss:$16 sps:$4 sm:$0xff]  }
  0x91   :  { %1732 = vmatpush1.bf16.msra.mxu0 %v3063_v53  ;;  %1815 = vmatprep.subr.bf16.mxu1 %v3074_v56  ;;  %v3155_v53 = vld [vmem:[#allocation3 + $0x724] ss:$16 sps:$4 sm:$0xff]   ;;  %v3156_v56 = vld [vmem:[#allocation3 + $0x328] ss:$16 sps:$4 sm:$0xff]  }
  0x92   :  { %1733 = vmatprep.subr.bf16.mxu0 %v3071_v55  ;;  %v3153_v55 = vld [vmem:[#allocation3 + $0x720] ss:$16 sps:$4 sm:$0xff]  }
  0x94   :  { %1816 = vmatpush1.bf16.msra.mxu1 %v3072_v58  ;;  %v3164_v58 = vld [vmem:[#allocation3 + $0x34c] ss:$16 sps:$4 sm:$0xff]  }
  0x95   :  { %1734 = vmatpush1.bf16.msra.mxu0 %v3069_v57  ;;  %1817 = vmatprep.subr.bf16.mxu1 %v3080_v60  ;;  %v3161_v57 = vld [vmem:[#allocation3 + $0x744] ss:$16 sps:$4 sm:$0xff]   ;;  %v3162_v60 = vld [vmem:[#allocation3 + $0x348] ss:$16 sps:$4 sm:$0xff]  }
  0x96   :  { %1735 = vmatprep.subr.bf16.mxu0 %v3077_v59  ;;  %v3159_v59 = vld [vmem:[#allocation3 + $0x740] ss:$16 sps:$4 sm:$0xff]  }
  0x98   :  { %1818 = vmatpush1.bf16.msra.mxu1 %v3078_v62  ;;  %v3170_v62 = vld [vmem:[#allocation3 + $0x36c] ss:$16 sps:$4 sm:$0xff]  }
  0x99   :  { %1736 = vmatpush1.bf16.msra.mxu0 %v3075_v61  ;;  %1819 = vmatprep.subr.bf16.mxu1 %v3086_v0  ;;  %v3167_v61 = vld [vmem:[#allocation3 + $0x764] ss:$16 sps:$4 sm:$0xff]   ;;  %v3168_v0 = vld [vmem:[#allocation3 + $0x368] ss:$16 sps:$4 sm:$0xff]  }
  0x9a   :  { %1737 = vmatprep.subr.bf16.mxu0 %v3083_v63  ;;  %v3165_v63 = vld [vmem:[#allocation3 + $0x760] ss:$16 sps:$4 sm:$0xff]  }
  0x9c   :  { %1820 = vmatpush1.bf16.msra.mxu1 %v3084_v2  ;;  %v3176_v2 = vld [vmem:[#allocation3 + $0x38c] ss:$16 sps:$4 sm:$0xff]  }
  0x9d   :  { %1738 = vmatpush1.bf16.msra.mxu0 %v3081_v1  ;;  %1821 = vmatprep.subr.bf16.mxu1 %v3092_v4  ;;  %v3173_v1 = vld [vmem:[#allocation3 + $0x784] ss:$16 sps:$4 sm:$0xff]   ;;  %v3174_v4 = vld [vmem:[#allocation3 + $0x388] ss:$16 sps:$4 sm:$0xff]  }
  0x9e   :  { %1739 = vmatprep.subr.bf16.mxu0 %v3089_v3  ;;  %v3171_v3 = vld [vmem:[#allocation3 + $0x780] ss:$16 sps:$4 sm:$0xff]  }
  0xa0   :  { %1822 = vmatpush1.bf16.msra.mxu1 %v3090_v6  ;;  %v3182_v6 = vld [vmem:[#allocation3 + $0x3ac] ss:$16 sps:$4 sm:$0xff]  }
  0xa1   :  { %1740 = vmatpush1.bf16.msra.mxu0 %v3087_v5  ;;  %1823 = vmatprep.subr.bf16.mxu1 %v3098_v9  ;;  %v3179_v5 = vld [vmem:[#allocation3 + $0x7a4] ss:$16 sps:$4 sm:$0xff]   ;;  %v3180_v9 = vld [vmem:[#allocation3 + $0x3a8] ss:$16 sps:$4 sm:$0xff]  }
  0xa2   :  { %1741 = vmatprep.subr.bf16.mxu0 %v3095_v7  ;;  %v3177_v7 = vld [vmem:[#allocation3 + $0x7a0] ss:$16 sps:$4 sm:$0xff]  }
  0xa4   :  { %1824 = vmatpush1.bf16.msra.mxu1 %v3096_v12  ;;  %v3188_v12 = vld [vmem:[#allocation3 + $0x3cc] ss:$16 sps:$4 sm:$0xff]  }
  0xa5   :  { %1742 = vmatpush1.bf16.msra.mxu0 %v3093_v10  ;;  %1834 = vmatprep.subr.bf16.mxu1 %v3104_v15  ;;  %v3185_v10 = vld [vmem:[#allocation3 + $0x7c4] ss:$16 sps:$4 sm:$0xff]  }
  0xa6   :  { %1752 = vmatprep.subr.bf16.mxu0 %v3101_v14  ;;  %v3186_v14 = vld [vmem:[#allocation3 + $0x3c8] ss:$16 sps:$4 sm:$0xff]   ;;  %v3191_v15 = vld [vmem:[#allocation3 + $0x7e4] ss:$16 sps:$4 sm:$0xff]  }
  0xa7   :  { %1826 = vmatmul.mubr.bf16.vlgmr.msra.gmra.mrb[4].mxu1 %v3527_v8  ;;  %v3122_v8 = vld [vmem:[#allocation3 + $0x26c] ss:$16 sps:$4 sm:$0xff]  }
  0xa8   :  { %1744 = vmatmul.mubr.bf16.vlgmr.msra.gmra.mrb[0].mxu0 %v3543_v16  ;;  %1835 = vmatpush1.bf16.msra.mxu1 %v3102_v18  ;;  %v3189_v18 = vld [vmem:[#allocation3 + $0x7e0] ss:$16 sps:$4 sm:$0xff]  }
  0xa9   :  { %1753 = vmatpush1.bf16.msra.mxu0 %v3099_v17  ;;  %1836 = vmatprep.subr.bf16.mxu1 %v3110_v20  ;;  %v3194_v17 = vld [vmem:[#allocation3 + $0x3ec] ss:$16 sps:$4 sm:$0xff]   ;;  %v61_v20 = vld [vmem:[%s3601_s0 + $0x30] sm:$0xff] }
  0xaa   :  { %1754 = vmatprep.subr.bf16.mxu0 %v3107_v19  ;;  %1784 = vmatprep.mubr.bf16.mxu0 %v3550_v24  ;;  %v3192_v19 = vld [vmem:[#allocation3 + $0x3e8] ss:$16 sps:$4 sm:$0xff]  }
  0xab   :  { %1866 = vmatprep.mubr.bf16.mxu1 %v3517_v52  ;;  %v3131_v52 = vld [vmem:[#allocation3 + $0x6a4] ss:$16 sps:$4 sm:$0xff]  }
  0xac   :  { %1837 = vmatpush1.bf16.msra.mxu1 %v3108_v23  ;;  %v3557_v23 = vpack.c.bf16 %v61_v20, %v61_v20  ;;  %v3245_v20 = vld [vmem:[#allocation3 + $0x60c] ss:$16 sps:$4 sm:$0xff]  }
  0xad   :  { %1755 = vmatpush1.bf16.msra.mxu0 %v3105_v22  ;;  %1838 = vmatprep.subr.bf16.mxu1 %v3116_v26  ;;  %v3195_v22 = vld [vmem:[#allocation3 + $0x408] ss:$16 sps:$4 sm:$0xff]  }
  0xae   :  { %1756 = vmatprep.subr.bf16.mxu0 %v3113_v25  ;;  %v3200_v25 = vld [vmem:[#allocation3 + $0x42c] ss:$16 sps:$4 sm:$0xff]   ;;  %v3291_v26 = vld [vmem:[#allocation5] ss:$8 sps:$4 sm:$0xff]  }
  0xb0   :  { %1839 = vmatpush1.bf16.msra.mxu1 %v3114_v28  ;;  %v3198_v28 = vld [vmem:[#allocation3 + $0x428] ss:$16 sps:$4 sm:$0xff]  }
  0xb1   :  { %1757 = vmatpush1.bf16.msra.mxu0 %v3111_v27  ;;  %1840 = vmatprep.subr.bf16.mxu1 %v3122_v8  ;;  %v3293_v27 = vld [vmem:[#allocation5 + $0x4] ss:$8 sps:$4 sm:$0xff]  }
  0xb2   :  { %1758 = vmatprep.subr.bf16.mxu0 %v3119_v29  ;;  %v3296_v29 = vld [vmem:[#allocation5 + $0x14] ss:$8 sps:$4 sm:$0xff]  }
  0xb3   :  { %v3203_v8 = vld [vmem:[#allocation3 + $0x44c] ss:$16 sps:$4 sm:$0xff]  }
  0xb4   :  { %1841 = vmatpush1.bf16.msra.mxu1 %v3120_v31  ;;  %v3299_v31 = vld [vmem:[#allocation5 + $0x24] ss:$8 sps:$4 sm:$0xff]  }
  0xb5   :  { %1759 = vmatpush1.bf16.msra.mxu0 %v3117_v30  ;;  %1842 = vmatprep.subr.bf16.mxu1 %v3128_v33  ;;  %v3294_v30 = vld [vmem:[#allocation5 + $0x10] ss:$8 sps:$4 sm:$0xff]   ;;  %v3206_v33 = vld [vmem:[#allocation3 + $0x46c] ss:$16 sps:$4 sm:$0xff]  }
  0xb6   :  { %1760 = vmatprep.subr.bf16.mxu0 %v3125_v32  ;;  %v3201_v32 = vld [vmem:[#allocation3 + $0x448] ss:$16 sps:$4 sm:$0xff]  }
  0xb8   :  { %1843 = vmatpush1.bf16.msra.mxu1 %v3126_v35  ;;  %v3204_v35 = vld [vmem:[#allocation3 + $0x468] ss:$16 sps:$4 sm:$0xff]  }
  0xb9   :  { %1761 = vmatpush1.bf16.msra.mxu0 %v3123_v34  ;;  %1844 = vmatprep.subr.bf16.mxu1 %v3134_v37  ;;  %v3302_v34 = vld [vmem:[#allocation5 + $0x34] ss:$8 sps:$4 sm:$0xff]   ;;  %v3305_v37 = vld [vmem:[#allocation5 + $0x44] ss:$8 sps:$4 sm:$0xff]  }
  0xba   :  { %1762 = vmatprep.subr.bf16.mxu0 %v3131_v52  ;;  %v3300_v52 = vld [vmem:[#allocation5 + $0x30] ss:$8 sps:$4 sm:$0xff]  }
  0xbc   :  { %1845 = vmatpush1.bf16.msra.mxu1 %v3132_v39  ;;  %v3212_v39 = vld [vmem:[#allocation3 + $0x4ac] ss:$16 sps:$4 sm:$0xff]  }
  0xbd   :  { %1763 = vmatpush1.bf16.msra.mxu0 %v3129_v38  ;;  %1846 = vmatprep.subr.bf16.mxu1 %v3140_v41  ;;  %v3207_v38 = vld [vmem:[#allocation3 + $0x488] ss:$16 sps:$4 sm:$0xff]   ;;  %v3308_v41 = vld [vmem:[#allocation5 + $0x54] ss:$8 sps:$4 sm:$0xff]  }
  0xbe   :  { %1764 = vmatprep.subr.bf16.mxu0 %v3137_v40  ;;  %v3303_v40 = vld [vmem:[#allocation5 + $0x40] ss:$8 sps:$4 sm:$0xff]  }
  0xc0   :  { %1847 = vmatpush1.bf16.msra.mxu1 %v3138_v43  ;;  %v3215_v43 = vld [vmem:[#allocation3 + $0x4cc] ss:$16 sps:$4 sm:$0xff]  }
  0xc1   :  { %1765 = vmatpush1.bf16.msra.mxu0 %v3135_v42  ;;  %1848 = vmatprep.subr.bf16.mxu1 %v3146_v45  ;;  %v3210_v42 = vld [vmem:[#allocation3 + $0x4a8] ss:$16 sps:$4 sm:$0xff]   ;;  %v3311_v45 = vld [vmem:[#allocation5 + $0x64] ss:$8 sps:$4 sm:$0xff]  }
  0xc2   :  { %1766 = vmatprep.subr.bf16.mxu0 %v3143_v44  ;;  %v3306_v44 = vld [vmem:[#allocation5 + $0x50] ss:$8 sps:$4 sm:$0xff]  }
  0xc4   :  { %1849 = vmatpush1.bf16.msra.mxu1 %v3144_v47  ;;  %v3218_v47 = vld [vmem:[#allocation3 + $0x4ec] ss:$16 sps:$4 sm:$0xff]  }
  0xc5   :  { %1767 = vmatpush1.bf16.msra.mxu0 %v3141_v46  ;;  %1850 = vmatprep.subr.bf16.mxu1 %v3152_v49  ;;  %v3213_v46 = vld [vmem:[#allocation3 + $0x4c8] ss:$16 sps:$4 sm:$0xff]   ;;  %v3314_v49 = vld [vmem:[#allocation5 + $0x74] ss:$8 sps:$4 sm:$0xff]  }
  0xc6   :  { %1768 = vmatprep.subr.bf16.mxu0 %v3149_v48  ;;  %v3309_v48 = vld [vmem:[#allocation5 + $0x60] ss:$8 sps:$4 sm:$0xff]  }
  0xc8   :  { %1851 = vmatpush1.bf16.msra.mxu1 %v3150_v51  ;;  %v3221_v51 = vld [vmem:[#allocation3 + $0x50c] ss:$16 sps:$4 sm:$0xff]  }
  0xc9   :  { %1769 = vmatpush1.bf16.msra.mxu0 %v3147_v50  ;;  %1852 = vmatprep.subr.bf16.mxu1 %v3158_v54  ;;  %v3216_v50 = vld [vmem:[#allocation3 + $0x4e8] ss:$16 sps:$4 sm:$0xff]   ;;  %v3317_v54 = vld [vmem:[#allocation5 + $0x84] ss:$8 sps:$4 sm:$0xff]  }
  0xca   :  { %1770 = vmatprep.subr.bf16.mxu0 %v3155_v53  ;;  %v3312_v53 = vld [vmem:[#allocation5 + $0x70] ss:$8 sps:$4 sm:$0xff]  }
  0xcc   :  { %1853 = vmatpush1.bf16.msra.mxu1 %v3156_v56  ;;  %v3224_v56 = vld [vmem:[#allocation3 + $0x52c] ss:$16 sps:$4 sm:$0xff]  }
  0xcd   :  { %1771 = vmatpush1.bf16.msra.mxu0 %v3153_v55  ;;  %1854 = vmatprep.subr.bf16.mxu1 %v3164_v58  ;;  %v3219_v55 = vld [vmem:[#allocation3 + $0x508] ss:$16 sps:$4 sm:$0xff]   ;;  %v3320_v58 = vld [vmem:[#allocation5 + $0x94] ss:$8 sps:$4 sm:$0xff]  }
  0xce   :  { %1772 = vmatprep.subr.bf16.mxu0 %v3161_v57  ;;  %v3315_v57 = vld [vmem:[#allocation5 + $0x80] ss:$8 sps:$4 sm:$0xff]  }
  0xd0   :  { %1855 = vmatpush1.bf16.msra.mxu1 %v3162_v60  ;;  %v3227_v60 = vld [vmem:[#allocation3 + $0x54c] ss:$16 sps:$4 sm:$0xff]  }
  0xd1   :  { %1773 = vmatpush1.bf16.msra.mxu0 %v3159_v59  ;;  %1856 = vmatprep.subr.bf16.mxu1 %v3170_v62  ;;  %v3222_v59 = vld [vmem:[#allocation3 + $0x528] ss:$16 sps:$4 sm:$0xff]   ;;  %v3323_v62 = vld [vmem:[#allocation5 + $0xa4] ss:$8 sps:$4 sm:$0xff]  }
  0xd2   :  { %1774 = vmatprep.subr.bf16.mxu0 %v3167_v61  ;;  %v3318_v61 = vld [vmem:[#allocation5 + $0x90] ss:$8 sps:$4 sm:$0xff]  }
  0xd4   :  { %1857 = vmatpush1.bf16.msra.mxu1 %v3168_v0  ;;  %v3230_v0 = vld [vmem:[#allocation3 + $0x56c] ss:$16 sps:$4 sm:$0xff]  }
  0xd5   :  { %1775 = vmatpush1.bf16.msra.mxu0 %v3165_v63  ;;  %1858 = vmatprep.subr.bf16.mxu1 %v3176_v2  ;;  %v3225_v63 = vld [vmem:[#allocation3 + $0x548] ss:$16 sps:$4 sm:$0xff]   ;;  %v3326_v2 = vld [vmem:[#allocation5 + $0xb4] ss:$8 sps:$4 sm:$0xff]  }
  0xd6   :  { %1776 = vmatprep.subr.bf16.mxu0 %v3173_v1  ;;  %v3321_v1 = vld [vmem:[#allocation5 + $0xa0] ss:$8 sps:$4 sm:$0xff]  }
  0xd8   :  { %1859 = vmatpush1.bf16.msra.mxu1 %v3174_v4  ;;  %v3233_v4 = vld [vmem:[#allocation3 + $0x58c] ss:$16 sps:$4 sm:$0xff]  }
  0xd9   :  { %1777 = vmatpush1.bf16.msra.mxu0 %v3171_v3  ;;  %1860 = vmatprep.subr.bf16.mxu1 %v3182_v6  ;;  %v3228_v3 = vld [vmem:[#allocation3 + $0x568] ss:$16 sps:$4 sm:$0xff]   ;;  %v3329_v6 = vld [vmem:[#allocation5 + $0xc4] ss:$8 sps:$4 sm:$0xff]  }
  0xda   :  { %1778 = vmatprep.subr.bf16.mxu0 %v3179_v5  ;;  %v3324_v5 = vld [vmem:[#allocation5 + $0xb0] ss:$8 sps:$4 sm:$0xff]  }
  0xdc   :  { %1861 = vmatpush1.bf16.msra.mxu1 %v3180_v9  ;;  %v3236_v9 = vld [vmem:[#allocation3 + $0x5ac] ss:$16 sps:$4 sm:$0xff]  }
  0xdd   :  { %1779 = vmatpush1.bf16.msra.mxu0 %v3177_v7  ;;  %1862 = vmatprep.subr.bf16.mxu1 %v3188_v12  ;;  %v3231_v7 = vld [vmem:[#allocation3 + $0x588] ss:$16 sps:$4 sm:$0xff]   ;;  %v3332_v12 = vld [vmem:[#allocation5 + $0xd4] ss:$8 sps:$4 sm:$0xff]  }
  0xde   :  { %1780 = vmatprep.subr.bf16.mxu0 %v3185_v10  ;;  %v3327_v10 = vld [vmem:[#allocation5 + $0xc0] ss:$8 sps:$4 sm:$0xff]  }
  0xe0   :  { %1863 = vmatpush1.bf16.msra.mxu1 %v3186_v14  ;;  %v3239_v14 = vld [vmem:[#allocation3 + $0x5cc] ss:$16 sps:$4 sm:$0xff]  }
  0xe1   :  { %1781 = vmatpush1.bf16.msra.mxu0 %v3183_v13  ;;  %1864 = vmatprep.subr.bf16.mxu1 %v3194_v17  ;;  %v3234_v13 = vld [vmem:[#allocation3 + $0x5a8] ss:$16 sps:$4 sm:$0xff]  }
  0xe2   :  { %1782 = vmatprep.subr.bf16.mxu0 %v3191_v15  ;;  %v3330_v15 = vld [vmem:[#allocation5 + $0xd0] ss:$8 sps:$4 sm:$0xff]  }
  0xe3   :  { %v3237_v17 = vld [vmem:[#allocation3 + $0x5c8] ss:$16 sps:$4 sm:$0xff]  }
  0xe4   :  { %1865 = vmatpush1.bf16.msra.mxu1 %v3192_v19  ;;  %v3240_v19 = vld [vmem:[#allocation3 + $0x5e8] ss:$16 sps:$4 sm:$0xff]  }
  0xe5   :  { %1783 = vmatpush1.bf16.msra.mxu0 %v3189_v18  ;;  %1875 = vmatprep.subr.bf16.mxu1 %v3197_v21  ;;  %v3242_v18 = vld [vmem:[#allocation3 + $0x5ec] ss:$16 sps:$4 sm:$0xff]   ;;  %v3243_v21 = vld [vmem:[#allocation3 + $0x608] ss:$16 sps:$4 sm:$0xff]  }
  0xe6   :  { %2365 = vmatprep.subr.bf16.mxu0 %v3293_v27  ;;  %v3249_v27 = vld [vmem:[#allocation3 + $0x648] ss:$16 sps:$4 sm:$0xff]  }
  0xe7   :  { %1867 = vmatmul.mubr.bf16.vlgmr.msra.gmra.mrb[4].mxu1 %v3529_v11  ;;  %v3297_v11 = vld [vmem:[#allocation5 + $0x20] ss:$8 sps:$4 sm:$0xff]  }
  0xe8   :  { %1785 = vmatmul.mubr.bf16.vlgmr.msra.gmra.mrb[0].mxu0 %v3557_v23  ;;  %1876 = vmatpush1.bf16.msra.mxu1 %v3195_v22  ;;  %v3248_v22 = vld [vmem:[#allocation3 + $0x62c] ss:$16 sps:$4 sm:$0xff]  }
  0xe9   :  { %1907 = vmatprep.mubr.bf16.mxu1 %v3537_v36  ;;  %1877 = vmatprep.subr.bf16.mxu1 %v3200_v25  ;;  %v3209_v36 = vld [vmem:[#allocation3 + $0x48c] ss:$16 sps:$4 sm:$0xff]   ;;  %v3246_v25 = vld [vmem:[#allocation3 + $0x628] ss:$16 sps:$4 sm:$0xff]  }
  0xea   :  { %2366 = vmatpush1.bf16.msra.mxu0 %v3291_v26  ;;  %v3251_v26 = vld [vmem:[#allocation3 + $0x64c] ss:$16 sps:$4 sm:$0xff]  }
  0xeb   :  { %2367 = vmatprep.subr.bf16.mxu0 %v3296_v29  ;;  %v3252_v29 = vld [vmem:[#allocation3 + $0x668] ss:$16 sps:$4 sm:$0xff]  }
  0xec   :  { %1878 = vmatpush1.bf16.msra.mxu1 %v3198_v28  ;;  %v3254_v28 = vld [vmem:[#allocation3 + $0x66c] ss:$16 sps:$4 sm:$0xff]  }
  0xed   :  { %1879 = vmatprep.subr.bf16.mxu1 %v3203_v8  ;;  %v3257_v8 = vld [vmem:[#allocation3 + $0x68c] ss:$16 sps:$4 sm:$0xff]  }
  0xee   :  { %2368 = vmatpush1.bf16.msra.mxu0 %v3294_v30  ;;  %v3255_v30 = vld [vmem:[#allocation3 + $0x688] ss:$16 sps:$4 sm:$0xff]  }
  0xef   :  { %2369 = vmatprep.subr.bf16.mxu0 %v3299_v31  ;;  %v3260_v31 = vld [vmem:[#allocation3 + $0x6ac] ss:$16 sps:$4 sm:$0xff]  }
  0xf0   :  { %1880 = vmatpush1.bf16.msra.mxu1 %v3201_v32  ;;  %v3263_v32 = vld [vmem:[#allocation3 + $0x6cc] ss:$16 sps:$4 sm:$0xff]  }
  0xf1   :  { %1881 = vmatprep.subr.bf16.mxu1 %v3206_v33 }
  0xf2   :  { %2370 = vmatpush1.bf16.msra.mxu0 %v3297_v11  ;;  %v3335_v11 = vld [vmem:[#allocation5 + $0xe4] ss:$8 sps:$4 sm:$0xff]  }
  0xf3   :  { %2371 = vmatprep.subr.bf16.mxu0 %v3302_v34 }
  0xf4   :  { %1882 = vmatpush1.bf16.msra.mxu1 %v3204_v35  ;;  %v3261_v35 = vld [vmem:[#allocation3 + $0x6c8] ss:$16 sps:$4 sm:$0xff]  }
  0xf5   :  { %1883 = vmatprep.subr.bf16.mxu1 %v3209_v36  ;;  %v3333_v36 = vld [vmem:[#allocation5 + $0xe0] ss:$8 sps:$4 sm:$0xff]  }
  0xf6   :  { %2372 = vmatpush1.bf16.msra.mxu0 %v3300_v52 }
  0xf7   :  { %2373 = vmatprep.subr.bf16.mxu0 %v3305_v37  ;;  %v3266_v37 = vld [vmem:[#allocation3 + $0x6ec] ss:$16 sps:$4 sm:$0xff]  }
  0xf8   :  { %1884 = vmatpush1.bf16.msra.mxu1 %v3207_v38  ;;  %v3338_v38 = vld [vmem:[#allocation5 + $0xf4] ss:$8 sps:$4 sm:$0xff]  }
  0xf9   :  { %1885 = vmatprep.subr.bf16.mxu1 %v3212_v39  ;;  %v3264_v39 = vld [vmem:[#allocation3 + $0x6e8] ss:$16 sps:$4 sm:$0xff]  }
  0xfa   :  { %2374 = vmatpush1.bf16.msra.mxu0 %v3303_v40  ;;  %v3336_v40 = vld [vmem:[#allocation5 + $0xf0] ss:$8 sps:$4 sm:$0xff]  }
  0xfb   :  { %2375 = vmatprep.subr.bf16.mxu0 %v3308_v41  ;;  %v3269_v41 = vld [vmem:[#allocation3 + $0x70c] ss:$16 sps:$4 sm:$0xff]  }
  0xfc   :  { %1886 = vmatpush1.bf16.msra.mxu1 %v3210_v42  ;;  %v3267_v42 = vld [vmem:[#allocation3 + $0x708] ss:$16 sps:$4 sm:$0xff]  }
  0xfd   :  { %1887 = vmatprep.subr.bf16.mxu1 %v3215_v43  ;;  %v3272_v43 = vld [vmem:[#allocation3 + $0x72c] ss:$16 sps:$4 sm:$0xff]  }
  0xfe   :  { %2376 = vmatpush1.bf16.msra.mxu0 %v3306_v44  ;;  %v3341_v44 = vld [vmem:[#allocation5 + $0x104] ss:$8 sps:$4 sm:$0xff]  }
  0xff   :  { %2377 = vmatprep.subr.bf16.mxu0 %v3311_v45  ;;  %v3270_v45 = vld [vmem:[#allocation3 + $0x728] ss:$16 sps:$4 sm:$0xff]  }
 0x100   :  { %1888 = vmatpush1.bf16.msra.mxu1 %v3213_v46  ;;  %v3275_v46 = vld [vmem:[#allocation3 + $0x74c] ss:$16 sps:$4 sm:$0xff]  }
 0x101   :  { %1889 = vmatprep.subr.bf16.mxu1 %v3218_v47  ;;  %v3273_v47 = vld [vmem:[#allocation3 + $0x748] ss:$16 sps:$4 sm:$0xff]  }
 0x102   :  { %2378 = vmatpush1.bf16.msra.mxu0 %v3309_v48  ;;  %v3278_v48 = vld [vmem:[#allocation3 + $0x76c] ss:$16 sps:$4 sm:$0xff]  }
 0x103   :  { %2379 = vmatprep.subr.bf16.mxu0 %v3314_v49  ;;  %v3276_v49 = vld [vmem:[#allocation3 + $0x768] ss:$16 sps:$4 sm:$0xff]  }
 0x104   :  { %1890 = vmatpush1.bf16.msra.mxu1 %v3216_v50  ;;  %v3281_v50 = vld [vmem:[#allocation3 + $0x78c] ss:$16 sps:$4 sm:$0xff]  }
 0x105   :  { %1891 = vmatprep.subr.bf16.mxu1 %v3221_v51  ;;  %v3279_v51 = vld [vmem:[#allocation3 + $0x788] ss:$16 sps:$4 sm:$0xff]  }
 0x106   :  { %2380 = vmatpush1.bf16.msra.mxu0 %v3312_v53  ;;  %v3284_v53 = vld [vmem:[#allocation3 + $0x7ac] ss:$16 sps:$4 sm:$0xff]  }
 0x107   :  { %2381 = vmatprep.subr.bf16.mxu0 %v3317_v54  ;;  %v3282_v54 = vld [vmem:[#allocation3 + $0x7a8] ss:$16 sps:$4 sm:$0xff]  }
 0x108   :  { %1892 = vmatpush1.bf16.msra.mxu1 %v3219_v55  ;;  %v3287_v55 = vld [vmem:[#allocation3 + $0x7cc] ss:$16 sps:$4 sm:$0xff]  }
 0x109   :  { %1893 = vmatprep.subr.bf16.mxu1 %v3224_v56  ;;  %v3285_v56 = vld [vmem:[#allocation3 + $0x7c8] ss:$16 sps:$4 sm:$0xff]  }
 0x10a   :  { %2382 = vmatpush1.bf16.msra.mxu0 %v3315_v57  ;;  %v3290_v57 = vld [vmem:[#allocation3 + $0x7ec] ss:$16 sps:$4 sm:$0xff]  }
 0x10b   :  { %2383 = vmatprep.subr.bf16.mxu0 %v3320_v58  ;;  %v3288_v58 = vld [vmem:[#allocation3 + $0x7e8] ss:$16 sps:$4 sm:$0xff]  }
 0x10c   :  { %1894 = vmatpush1.bf16.msra.mxu1 %v3222_v59  ;;  %v329_v59 = vlaneseq }
 0x10d   :  { %1895 = vmatprep.subr.bf16.mxu1 %v3227_v60 }
 0x10e   :  { %2384 = vmatpush1.bf16.msra.mxu0 %v3318_v61  ;;  %v3565_v60 = vshrl.u32 %v329_v59, 7 }
 0x10f   :  { %2385 = vmatprep.subr.bf16.mxu0 %v3323_v62  ;;  %v3573_v62 = vld [vmem:[%s3603_s2] sm:$0xf] }
 0x110   :  { %1896 = vmatpush1.bf16.msra.mxu1 %v3225_v63  ;;  %v3568_v61 = vsub.s32 0, %v3565_v60  ;;  %v335_v63 = vsub.s32 1, %v3565_v60 }
 0x111   :  { %1897 = vmatprep.subr.bf16.mxu1 %v3230_v0 }
 0x112   :  { %2386 = vmatpush1.bf16.msra.mxu0 %v3321_v1  ;;  %v332_v0 = vrot.slane %v3573_v62, %v3568_v61 }
 0x113   :  { %2387 = vmatprep.subr.bf16.mxu0 %v3326_v2 }
 0x114   :  { %1898 = vmatpush1.bf16.msra.mxu1 %v3228_v3 }
 0x115   :  { %1899 = vmatprep.subr.bf16.mxu1 %v3233_v4 }
 0x116   :  { %2388 = vmatpush1.bf16.msra.mxu0 %v3324_v5 }
 0x117   :  { %2389 = vmatprep.subr.bf16.mxu0 %v3329_v6 }
 0x118   :  { %1900 = vmatpush1.bf16.msra.mxu1 %v3231_v7 }
 0x119   :  { %1901 = vmatprep.subr.bf16.mxu1 %v3236_v9 }
 0x11a   :  { %2390 = vmatpush1.bf16.msra.mxu0 %v3327_v10 }
 0x11b   :  { %2391 = vmatprep.subr.bf16.mxu0 %v3332_v12 }
 0x11c   :  { %1902 = vmatpush1.bf16.msra.mxu1 %v3234_v13 }
 0x11d   :  { %1903 = vmatprep.subr.bf16.mxu1 %v3239_v14 }
 0x11e   :  { %2392 = vmatpush1.bf16.msra.mxu0 %v3330_v15 }
 0x11f   :  { %2393 = vmatprep.subr.bf16.mxu0 %v3335_v11  ;;  %v3368_v11 = vld [vmem:[#allocation5 + $0x194] ss:$8 sps:$4 sm:$0xff]  }
 0x120   :  { %1904 = vmatpush1.bf16.msra.mxu1 %v3237_v17  ;;  %v3339_v17 = vld [vmem:[#allocation5 + $0x100] ss:$8 sps:$4 sm:$0xff]  }
 0x121   :  { %1905 = vmatprep.subr.bf16.mxu1 %v3242_v18 }
 0x122   :  { %2394 = vmatpush1.bf16.msra.mxu0 %v3333_v36  ;;  %v3369_v36 = vld [vmem:[#allocation5 + $0x1a0] ss:$8 sps:$4 sm:$0xff]  }
 0x123   :  { %2395 = vmatprep.subr.bf16.mxu0 %v3338_v38  ;;  %v3377_v38 = vld [vmem:[#allocation5 + $0x1c4] ss:$8 sps:$4 sm:$0xff]  }
 0x124   :  { %1906 = vmatpush1.bf16.msra.mxu1 %v3240_v19  ;;  %v3344_v19 = vld [vmem:[#allocation5 + $0x114] ss:$8 sps:$4 sm:$0xff]  }
 0x125   :  { %1916 = vmatprep.subr.bf16.mxu1 %v3245_v20  ;;  %v3342_v20 = vld [vmem:[#allocation5 + $0x110] ss:$8 sps:$4 sm:$0xff]  }
 0x126   :  { %2396 = vmatpush1.bf16.msra.mxu0 %v3336_v40  ;;  %v3380_v40 = vld [vmem:[#allocation5 + $0x1d4] ss:$8 sps:$4 sm:$0xff]  }
 0x127   :  { %1908 = vmatmul.mubr.bf16.vlgmr.msra.gmra.mrb[4].mxu1 %v3543_v16  ;;  %v3258_v16 = vld [vmem:[#allocation3 + $0x6a8] ss:$16 sps:$4 sm:$0xff]   ;;  %2406 = vmatprep.subr.bf16.mxu0 %v3341_v44  ;;  %v3386_v44 = vld [vmem:[#allocation5 + $0x1f4] ss:$8 sps:$4 sm:$0xff]  }
 0x128   :  { %1917 = vmatpush1.bf16.msra.mxu1 %v3243_v21  ;;  %1948 = vmatprep.mubr.bf16.mxu1 %v3550_v24  ;;  %v3347_v21 = vld [vmem:[#allocation5 + $0x124] ss:$8 sps:$4 sm:$0xff]  }
 0x129   :  { %1918 = vmatprep.subr.bf16.mxu1 %v3248_v22  ;;  %v3345_v22 = vld [vmem:[#allocation5 + $0x120] ss:$8 sps:$4 sm:$0xff]  }
 0x12c   :  { %1919 = vmatpush1.bf16.msra.mxu1 %v3246_v25  ;;  %v3350_v25 = vld [vmem:[#allocation5 + $0x134] ss:$8 sps:$4 sm:$0xff]  }
 0x12d   :  { %1920 = vmatprep.subr.bf16.mxu1 %v3251_v26  ;;  %v3348_v26 = vld [vmem:[#allocation5 + $0x130] ss:$8 sps:$4 sm:$0xff]  }
 0x130   :  { %1921 = vmatpush1.bf16.msra.mxu1 %v3249_v27  ;;  %v3353_v27 = vld [vmem:[#allocation5 + $0x144] ss:$8 sps:$4 sm:$0xff]  }
 0x131   :  { %1922 = vmatprep.subr.bf16.mxu1 %v3254_v28  ;;  %v3351_v28 = vld [vmem:[#allocation5 + $0x140] ss:$8 sps:$4 sm:$0xff]  }
 0x134   :  { %1923 = vmatpush1.bf16.msra.mxu1 %v3252_v29  ;;  %v3356_v29 = vld [vmem:[#allocation5 + $0x154] ss:$8 sps:$4 sm:$0xff]  }
 0x135   :  { %1924 = vmatprep.subr.bf16.mxu1 %v3257_v8  ;;  %v3354_v8 = vld [vmem:[#allocation5 + $0x150] ss:$8 sps:$4 sm:$0xff]  }
 0x138   :  { %1925 = vmatpush1.bf16.msra.mxu1 %v3255_v30  ;;  %v3359_v30 = vld [vmem:[#allocation5 + $0x164] ss:$8 sps:$4 sm:$0xff]  }
 0x139   :  { %1926 = vmatprep.subr.bf16.mxu1 %v3260_v31  ;;  %v3357_v31 = vld [vmem:[#allocation5 + $0x160] ss:$8 sps:$4 sm:$0xff]  }
 0x13a   :  { %v1663_v33 = vpop.f32.mrb[0].mxu1 }
 0x13b   :  { %v1665_v24 = vpop.f32.mrb[1].mxu1  ;;  %v1664_v1 = vadd.f32 %v1663_v33, %v332_v0  ;;  %v3365_v33 = vld [vmem:[#allocation5 + $0x184] ss:$8 sps:$4 sm:$0xff]  }
 0x13c   :  { %v1667_v34 = vpop.f32.mrb[2].mxu1  ;;  %1927 = vmatpush1.bf16.msra.mxu1 %v3258_v16  ;;  %v3362_v16 = vld [vmem:[#allocation5 + $0x174] ss:$8 sps:$4 sm:$0xff]  }
 0x13d   :  { %v1668_v52 = vpop.f32.mrb[3].mxu1  ;;  %1928 = vmatprep.subr.bf16.mxu1 %v3263_v32  ;;  %v3360_v32 = vld [vmem:[#allocation5 + $0x170] ss:$8 sps:$4 sm:$0xff]  }
 0x13e   :  { %v3366_v34 = vld [vmem:[#allocation5 + $0x190] ss:$8 sps:$4 sm:$0xff]   ;;  %v3374_v52 = vld [vmem:[#allocation5 + $0x1b4] ss:$8 sps:$4 sm:$0xff]  }
 0x140   :  { %1929 = vmatpush1.bf16.msra.mxu1 %v3261_v35  ;;  %v3371_v35 = vld [vmem:[#allocation5 + $0x1a4] ss:$8 sps:$4 sm:$0xff]  }
 0x141   :  { %1930 = vmatprep.subr.bf16.mxu1 %v3266_v37  ;;  %v3372_v37 = vld [vmem:[#allocation5 + $0x1b0] ss:$8 sps:$4 sm:$0xff]  }
 0x144   :  { %1931 = vmatpush1.bf16.msra.mxu1 %v3264_v39  ;;  %v3375_v39 = vld [vmem:[#allocation5 + $0x1c0] ss:$8 sps:$4 sm:$0xff]  }
 0x145   :  { %1932 = vmatprep.subr.bf16.mxu1 %v3269_v41  ;;  %v3378_v41 = vld [vmem:[#allocation5 + $0x1d0] ss:$8 sps:$4 sm:$0xff]  }
 0x148   :  { %1933 = vmatpush1.bf16.msra.mxu1 %v3267_v42  ;;  %v3383_v42 = vld [vmem:[#allocation5 + $0x1e4] ss:$8 sps:$4 sm:$0xff]  }
 0x149   :  { %1934 = vmatprep.subr.bf16.mxu1 %v3272_v43  ;;  %v3381_v43 = vld [vmem:[#allocation5 + $0x1e0] ss:$8 sps:$4 sm:$0xff]  }
 0x14c   :  { %1935 = vmatpush1.bf16.msra.mxu1 %v3270_v45  ;;  %v3384_v45 = vld [vmem:[#allocation5 + $0x1f0] ss:$8 sps:$4 sm:$0xff]  }
 0x14d   :  { %1936 = vmatprep.subr.bf16.mxu1 %v3275_v46  ;;  %v339_v46 = vsub.s32 2, %v3565_v60 }
 0x150   :  { %1937 = vmatpush1.bf16.msra.mxu1 %v3273_v47  ;;  %v343_v47 = vsub.s32 3, %v3565_v60  ;;  %v2454_v60 = vstv %s3607_s6 }
 0x151   :  { %1938 = vmatprep.subr.bf16.mxu1 %v3278_v48  ;;  %v340_v48 = vrot.slane %v3573_v62, %v339_v46 }
 0x154   :  { %1939 = vmatpush1.bf16.msra.mxu1 %v3276_v49  ;;  %v344_v49 = vrot.slane %v3573_v62, %v343_v47 }
 0x155   :  { %1940 = vmatprep.subr.bf16.mxu1 %v3281_v50 }
 0x158   :  { %1941 = vmatpush1.bf16.msra.mxu1 %v3279_v51 }
 0x159   :  { %1942 = vmatprep.subr.bf16.mxu1 %v3284_v53 }
 0x15c   :  { %1943 = vmatpush1.bf16.msra.mxu1 %v3282_v54 }
 0x15d   :  { %1944 = vmatprep.subr.bf16.mxu1 %v3287_v55 }
 0x160   :  { %1945 = vmatpush1.bf16.msra.mxu1 %v3285_v56 }
 0x161   :  { %1946 = vmatprep.subr.bf16.mxu1 %v3290_v57 }
 0x164   :  { %1947 = vmatpush1.bf16.msra.mxu1 %v3288_v58 }
 0x167   :  { %1949 = vmatmul.mubr.bf16.vlgmr.msra.gmra.mrb[4].mxu1 %v3557_v23  ;;  %v336_v23 = vrot.slane %v3573_v62, %v335_v63 }
 0x169   :  { %v1666_v2 = vadd.f32 %v1665_v24, %v336_v23  ;;  %v3363_v24 = vld [vmem:[#allocation5 + $0x180] ss:$8 sps:$4 sm:$0xff]  }
 0x1bb   :  { %v1786_v3 = vpop.f32.mrb[0].mxu0 }
 0x1bc   :  { %v2870_v4 = vadd.f32 %v1786_v3, %v1664_v1  ;;  %v1788_v5 = vpop.f32.mrb[1].mxu0 }
 0x1bd   :  { %v2872_v6 = vadd.f32 %v1788_v5, %v1666_v2  ;;  %v1790_v7 = vpop.f32.mrb[2].mxu0  ;;  %v2451_v2 = vld [vmem:[%s3606_s5] sm:$0x3] }
 0x1be   :  { %v1957_v9 = vmul.f32 0.2, %v2870_v4  ;;  %v1791_v10 = vpop.f32.mrb[3].mxu0  ;;  %v2452_v3 = vunpack.c.l.bf16 %v2451_v2 }
 0x1bf   :  { %v1958_v12 = vmul.f32 0.2, %v2872_v6 }
 0x1c0   :  { %v1961_v13 = vmax.f32 %v2870_v4, %v1957_v9  ;;  %v2463_v62 = vrot.slane %v2452_v3, %v339_v46  ;;  %v2033_v4 = vld [vmem:[%s3605_s4] sm:$0x3] }
 0x1c1   :  { %v1962_v14 = vmax.f32 %v2872_v6, %v1958_v12  ;;  %v2038_v5 = vrot.slane %v2033_v4, %v3568_v61  ;;  %v2042_v6 = vrot.slane %v2033_v4, %v335_v63 }
 0x1c2   :  { %v1965_v18 = vpack.c.bf16 %v1961_v13, %v1961_v13  ;;  %2530 = vmatprep.mubr.f32.mxu1 %v2463_v62 }
 0x1c3   :  { %v1966_v15 = vpack.c.bf16 %v1962_v14, %v1962_v14 }
 0x1c5   :  { %2397 = vmatprep.mubr.bf16.mxu0 %v1966_v15 }
 0x1c6   :  { %2398 = vmatmul.mubr.bf16.vlgmr.msra.gmra.mrb[4].mxu0 %v1965_v18 }
 0x1c7   :  { %2407 = vmatpush1.bf16.msra.mxu0 %v3339_v17 }
 0x1c8   :  { %2408 = vmatprep.subr.bf16.mxu0 %v3344_v19 }
 0x1cb   :  { %2409 = vmatpush1.bf16.msra.mxu0 %v3342_v20  ;;  %v2459_v20 = vrot.slane %v2452_v3, %v3568_v61 }
 0x1cc   :  { %2410 = vmatprep.subr.bf16.mxu0 %v3347_v21 }
 0x1cf   :  { %2411 = vmatpush1.bf16.msra.mxu0 %v3345_v22 }
 0x1d0   :  { %2412 = vmatprep.subr.bf16.mxu0 %v3350_v25 }
 0x1d3   :  { %2413 = vmatpush1.bf16.msra.mxu0 %v3348_v26 }
 0x1d4   :  { %2414 = vmatprep.subr.bf16.mxu0 %v3353_v27 }
 0x1d7   :  { %2415 = vmatpush1.bf16.msra.mxu0 %v3351_v28 }
 0x1d8   :  { %2416 = vmatprep.subr.bf16.mxu0 %v3356_v29 }
 0x1db   :  { %2417 = vmatpush1.bf16.msra.mxu0 %v3354_v8 }
 0x1dc   :  { %2418 = vmatprep.subr.bf16.mxu0 %v3359_v30 }
 0x1df   :  { %2419 = vmatpush1.bf16.msra.mxu0 %v3357_v31 }
 0x1e0   :  { %2420 = vmatprep.subr.bf16.mxu0 %v3362_v16 }
 0x1e3   :  { %2421 = vmatpush1.bf16.msra.mxu0 %v3360_v32 }
 0x1e4   :  { %2422 = vmatprep.subr.bf16.mxu0 %v3365_v33 }
 0x1e7   :  { %2423 = vmatpush1.bf16.msra.mxu0 %v3363_v24 }
 0x1e8   :  { %2424 = vmatprep.subr.bf16.mxu0 %v3368_v11 }
 0x1eb   :  { %2425 = vmatpush1.bf16.msra.mxu0 %v3366_v34 }
 0x1ec   :  { %2426 = vmatprep.subr.bf16.mxu0 %v3371_v35 }
 0x1ef   :  { %2427 = vmatpush1.bf16.msra.mxu0 %v3369_v36 }
 0x1f0   :  { %2428 = vmatprep.subr.bf16.mxu0 %v3374_v52 }
 0x1f3   :  { %2429 = vmatpush1.bf16.msra.mxu0 %v3372_v37 }
 0x1f4   :  { %2430 = vmatprep.subr.bf16.mxu0 %v3377_v38 }
 0x1f7   :  { %2431 = vmatpush1.bf16.msra.mxu0 %v3375_v39 }
 0x1f8   :  { %2432 = vmatprep.subr.bf16.mxu0 %v3380_v40 }
 0x1fb   :  { %2433 = vmatpush1.bf16.msra.mxu0 %v3378_v41 }
 0x1fc   :  { %2434 = vmatprep.subr.bf16.mxu0 %v3383_v42 }
 0x1ff   :  { %2435 = vmatpush1.bf16.msra.mxu0 %v3381_v43 }
 0x200   :  { %2436 = vmatprep.subr.bf16.mxu0 %v3386_v44 }
 0x203   :  { %2437 = vmatpush1.bf16.msra.mxu0 %v3384_v45 }
 0x23a   :  { %v1950_v50 = vpop.f32.mrb[4].mxu1 }
 0x23b   :  { %v2873_v51 = vadd.f32 %v1950_v50, %v340_v48  ;;  %v1952_v53 = vpop.f32.mrb[5].mxu1 }
 0x23c   :  { %v2874_v54 = vadd.f32 %v1952_v53, %v344_v49  ;;  %v1954_v55 = vpop.f32.mrb[6].mxu1 }
 0x23d   :  { %v1959_v56 = vmul.f32 0.2, %v2873_v51  ;;  %v1955_v57 = vpop.f32.mrb[7].mxu1 }
 0x23e   :  { %v1960_v58 = vmul.f32 0.2, %v2874_v54 }
 0x23f   :  { %v1963_v59 = vmax.f32 %v2873_v51, %v1959_v56 }
 0x240   :  { %v1964_v0 = vmax.f32 %v2874_v54, %v1960_v58 }
 0x241   :  { %v1967_v1 = vpack.c.bf16 %v1963_v59, %v1963_v59 }
 0x242   :  { %v1968_v23 = vpack.c.bf16 %v1964_v0, %v1964_v0 }
 0x244   :  { %2438 = vmatprep.mubr.bf16.mxu0 %v1968_v23 }
 0x245   :  { %2439 = vmatmul.mubr.bf16.vlgmr.msra.gmra.mrb[4].mxu0 %v1967_v1 }
 0x318   :  { %v2440_v7 = vpop.f32.mrb[4].mxu0 }
 0x319   :  { %v2875_v9 = vadd.f32 %v2440_v7, %v2038_v5  ;;  %v2442_v10 = vpop.f32.mrb[5].mxu0 }
 0x31a   :  { %v2876_v12 = vadd.f32 %v2442_v10, %v2042_v6  ;;  %v2444_v13 = vpop.f32.mrb[6].mxu0 }
 0x31b   :  { %v2447_v14 = vmul.f32 0.2, %v2875_v9  ;;  %v2445_v15 = vpop.f32.mrb[7].mxu0 }
 0x31c   :  { %v2448_v17 = vmul.f32 0.2, %v2876_v12 }
 0x31d   :  { %v2449_v19 = vmax.f32 %v2875_v9, %v2447_v14 }
 0x31e   :  { %v2450_v18 = vmax.f32 %v2876_v12, %v2448_v17 }
 0x320   :  { %2466 = vmatprep.subr.mxu1 %v2450_v18 }
 0x321   :  { %2467 = vmatpush1.xpose.msra.mxu1 %v2449_v19 }
 0x324   :  { %2531 = vmatmul.mubr.f32.vlgmr.msra.gmra.mrb[8].mxu1 %v2459_v20 }
 0x3f7   :  { %v2532_v63 = vpop.f32.mrb[8].mxu1 }
 0x3f8   :  { %v2533_v21 = vadd.f32 %v2532_v63, %v2454_v60  ;;  %v2534_v22 = vpop.f32.mrb[9].mxu1 }
 0x3fa   :  { %v2536_v25 = vsub.f32 0.0, %v2533_v21 }
 0x3fc   :  { %v2537_v26 = vmul.f32 1.442695, %v2536_v25 }
 0x3fe   :  { %3387 = vpow2.f32 %v2537_v26 }
 0x408   :  { %v3388_v27 = vpop.eup %3387 }
 0x409   :  { %v2539_v28 = vadd.f32 1.0, %v3388_v27 }
 0x40b   :  { %3389 = vrcp.f32 %v2539_v28 }
 0x415   :  { %v3390_v29 = vpop.eup %3389 }
 0x416   :  { %2542 = vst.msk [vmem:[%s3608_s7] sm:$0x1] %vm2541_vm0, %v3390_v29 }
 0x417   :  { %2547 = vsyncpa [#allocation4], 1 }
 0x418   :  { %2548 = vsyncpa [#allocation6], 1 }

</bundles_post_ra>
